<compile_context>
chip_gen: v6e
topology: v6e:2x2x1
jax: 0.10.0
libtpu: 0.0.40
codegen_flags: <defaults>
</compile_context>

<pallas_src>
import functools

import jax
import jax.numpy as jnp
from jax.experimental import pallas as pl
from jax.experimental.pallas import tpu as pltpu


def _head_kernel(f_ref, w_ref, b_ref, o_ref, *, hw_true, activation):
    # f_ref: (TB, C, HW) block (channel-major, no host transpose)
    # w_ref: (C, NC) resident; b_ref: (1, NC) resident; o_ref: (TB, NC)
    f = f_ref[...].astype(jnp.float32)                       # (TB, C, HW)
    # AdaptiveAvgPool2d((1,1)) == mean over spatial; HW is the lane axis here,
    # so this is an XLU cross-lane reduce. Divisor is the true H*W.
    pooled = jnp.sum(f, axis=-1) * (1.0 / hw_true)           # (TB, C), f32
    # replaced head: nn.Linear(512, n_classes) — one MXU matmul per block
    logits = jnp.dot(pooled, w_ref[...],
                     preferred_element_type=jnp.float32) + b_ref[...]   # (TB, NC)
    if activation == "softmax":
        m = jnp.max(logits, axis=-1, keepdims=True)
        e = jnp.exp(logits - m)
        denom = jnp.sum(e, axis=-1, keepdims=True)
        y = e * pl.reciprocal(denom, approx=True)
    elif activation == "sigmoid":
        e = jnp.exp(-logits)
        y = pl.reciprocal(1.0 + e, approx=True)
    elif activation is None:
        y = logits
    else:
        raise NotImplementedError(f"activation={activation}")
    o_ref[...] = y.astype(o_ref.dtype)


def tissue_tile_net_forward(features_nchw, fc_w, fc_b, activation=None,
                            block_batch=64):
    """Pallas forward for TissueTileNet (ResNet branch head).

    features_nchw: (N, 512, H, W) backbone feature map (NCHW, like PyTorch),
                   f32 or bf16.
    fc_w:          (512, n_classes)  (transposed PyTorch Linear weight)
    fc_b:          (1, n_classes)
    """
    N, C, H, W = features_nchw.shape
    HW = H * W
    n_classes = fc_w.shape[1]

    # Keep channel-major layout: (N, C, HW). Reshape is free (no transpose).
    f = features_nchw.reshape(N, C, HW)

    # Batch TB samples per grid step; pad N to a multiple of TB if needed
    # (padded rows pool to zero -> finite logits, sliced off below).
    TB = min(block_batch, N)
    n_blocks = pl.cdiv(N, TB)
    N_pad = n_blocks * TB
    if N_pad != N:
        f = jnp.pad(f, ((0, N_pad - N), (0, 0), (0, 0)))

    kernel = functools.partial(_head_kernel, hw_true=HW, activation=activation)

    # VMEM budget: double-buffered (TB, C, HW) input blocks + resident weight
    # and bias + double-buffered (TB, NC) output blocks, plus headroom.
    blk_bytes = TB * C * HW * f.dtype.itemsize
    needed = 2 * blk_bytes + 4 * (C * n_classes + n_classes + 2 * TB * n_classes)
    needed += 2 << 20
    compiler_kwargs = dict(dimension_semantics=("parallel",))
    if needed > (16 << 20):
        # Only raise past the most restrictive default when actually required;
        # cap below v7x's 64 MiB physical VMEM.
        compiler_kwargs["vmem_limit_bytes"] = min(needed, 56 << 20)

    out = pl.pallas_call(
        kernel,
        out_shape=jax.ShapeDtypeStruct((N_pad, n_classes), jnp.float32),
        grid_spec=pltpu.PrefetchScalarGridSpec(
            num_scalar_prefetch=0,
            grid=(n_blocks,),
            in_specs=[
                pl.BlockSpec((TB, C, HW), lambda i: (i, 0, 0)),     # features block
                pl.BlockSpec((C, n_classes), lambda i: (0, 0)),      # fc weight (resident)
                pl.BlockSpec((1, n_classes), lambda i: (0, 0)),      # fc bias   (resident)
            ],
            out_specs=pl.BlockSpec((TB, n_classes), lambda i: (i, 0)),
        ),
        compiler_params=pltpu.CompilerParams(**compiler_kwargs),
    )(f, fc_w, fc_b)

    return out[:N]


def _reference(features_nchw, fc_w, fc_b, activation=None):
    pooled = features_nchw.astype(jnp.float32).mean(axis=(2, 3))   # (N, 512)
    logits = pooled @ fc_w + fc_b[0]
    if activation == "softmax":
        return jax.nn.softmax(logits, axis=-1)
    if activation == "sigmoid":
        return jax.nn.sigmoid(logits)
    return logits


if __name__ == "__main__":
    key = jax.random.PRNGKey(0)
    k_feat, k_w, k_b = jax.random.split(key, 3)

    N, C, H, W = 2, 512, 4, 4        # small stand-in for resnet layer4 output
    n_classes = 8

    # synthetic backbone output (stands for self.model's feature extractor)
    features = jax.random.normal(k_feat, (N, C, H, W), dtype=jnp.float32)

    # deterministic init matching nn.Linear(512, n_classes) default
    bound = 1.0 / (C ** 0.5)
    fc_w = jax.random.uniform(k_w, (C, n_classes), jnp.float32, -bound, bound)
    fc_b = jax.random.uniform(k_b, (1, n_classes), jnp.float32, -bound, bound)

    # no-activation path: exact math, tight tolerance
    y_lin = tissue_tile_net_forward(features, fc_w, fc_b, activation=None)
    y_lin = jax.block_until_ready(y_lin)
    y_lin_ref = _reference(features, fc_w, fc_b, activation=None)
    assert y_lin.shape == (N, n_classes)
    assert jnp.allclose(y_lin, y_lin_ref, atol=1e-5, rtol=1e-5), "linear mismatch"

    # softmax path: uses approx EUP reciprocal -> slightly looser tolerance
    y_sm = tissue_tile_net_forward(features, fc_w, fc_b, activation="softmax")
    y_sm = jax.block_until_ready(y_sm)
    y_sm_ref = _reference(features, fc_w, fc_b, activation="softmax")
    assert y_sm.shape == (N, n_classes)
    assert jnp.allclose(y_sm, y_sm_ref, atol=2e-3, rtol=2e-3), "softmax mismatch"

    print("KERNEL_OK")
</pallas_src>

<mosaic_0001>
module attributes {stable_mosaic.version = 11 : i64} {
  func.func @_head_kernel(%arg0: i32, %arg1: memref<2x512x16xf32, #tpu.memory_space<vmem>>, %arg2: memref<512x8xf32, #tpu.memory_space<vmem>>, %arg3: memref<1x8xf32, #tpu.memory_space<vmem>>, %arg4: memref<2x8xf32, #tpu.memory_space<vmem>>) attributes {dimension_semantics = [#tpu.dimension_semantics<parallel>], iteration_bounds = array<i64: 1>, scalar_prefetch = 0 : i64, scratch_operands = 0 : i64, tpu.core_type = #tpu.core_type<tc>, window_params = [{transform_indices = @transform_0, window_bounds = array<i64: 2, 512, 16>}, {pipeline_mode = #tpu.pipeline_mode<synchronous>, transform_indices = @transform_1, window_bounds = array<i64: 512, 8>}, {pipeline_mode = #tpu.pipeline_mode<synchronous>, transform_indices = @transform_2, window_bounds = array<i64: 1, 8>}, {transform_indices = @transform_3, window_bounds = array<i64: 2, 8>}]} {
    %c0 = arith.constant 0 : index
    %c0_0 = arith.constant 0 : index
    %c0_1 = arith.constant 0 : index
    %0 = vector.load %arg1[%c0, %c0_0, %c0_1] : memref<2x512x16xf32, #tpu.memory_space<vmem>>, vector<2x512x16xf32>
    %cst = arith.constant dense<0.000000e+00> : vector<2x512xf32>
    %1 = vector.multi_reduction <add>, %0, %cst [2] : vector<2x512x16xf32> to vector<2x512xf32>
    %cst_2 = arith.constant 6.250000e-02 : f32
    %2 = vector.broadcast %cst_2 : f32 to vector<2x512xf32>
    %3 = arith.mulf %1, %2 : vector<2x512xf32>
    %c0_3 = arith.constant 0 : index
    %c0_4 = arith.constant 0 : index
    %4 = vector.load %arg2[%c0_3, %c0_4] : memref<512x8xf32, #tpu.memory_space<vmem>>, vector<512x8xf32>
    %cst_5 = arith.constant dense<0.000000e+00> : vector<2x8xf32>
    %5 = tpu.matmul %3, %4, %cst_5 {dimension_numbers = #tpu.dot_dimension_numbers<[1], [0], [0], [1], [0, 0, 1, 1], [], []>} : vector<2x512xf32>, vector<512x8xf32>, vector<2x8xf32> -> vector<2x8xf32>
    %c0_6 = arith.constant 0 : index
    %c0_7 = arith.constant 0 : index
    %6 = vector.load %arg3[%c0_6, %c0_7] : memref<1x8xf32, #tpu.memory_space<vmem>>, vector<1x8xf32>
    %7 = vector.broadcast %6 : vector<1x8xf32> to vector<2x8xf32>
    %8 = arith.addf %5, %7 : vector<2x8xf32>
    %c0_8 = arith.constant 0 : index
    %c0_9 = arith.constant 0 : index
    %9 = vector.load %arg4[%c0_8, %c0_9] : memref<2x8xf32, #tpu.memory_space<vmem>>, vector<2x8xf32>
    tpu.vector_store %arg4[%c0_8, %c0_9], %8 {strides = array<i32>} : memref<2x8xf32, #tpu.memory_space<vmem>>, vector<2x8xf32>,
    return
  }
  func.func @transform_0(%arg0: i32) -> (i32, i32, i32) {
    %c0_i32 = arith.constant 0 : i32
    %c0_i32_0 = arith.constant 0 : i32
    %c0_i32_1 = arith.constant 0 : i32
    return %arg0, %c0_i32, %c0_i32_0 : i32, i32, i32
  }
  func.func @transform_1(%arg0: i32) -> (i32, i32) {
    %c0_i32 = arith.constant 0 : i32
    %c0_i32_0 = arith.constant 0 : i32
    %c0_i32_1 = arith.constant 0 : i32
    return %c0_i32, %c0_i32_0 : i32, i32
  }
  func.func @transform_2(%arg0: i32) -> (i32, i32) {
    %c0_i32 = arith.constant 0 : i32
    %c0_i32_0 = arith.constant 0 : i32
    %c0_i32_1 = arith.constant 0 : i32
    return %c0_i32, %c0_i32_0 : i32, i32
  }
  func.func @transform_3(%arg0: i32) -> (i32, i32) {
    %c0_i32 = arith.constant 0 : i32
    %c0_i32_0 = arith.constant 0 : i32
    return %arg0, %c0_i32 : i32, i32
  }
}

</mosaic_0001>

<bundles_post_ra>
// kernel: tpu_custom_call.1
= control target key start
LH: loop header
LB: loop body
LE: loop exit
PB: predicated region body
PF: predicated region fallthrough
CT: control target
= control target key end

     0   :  { %vm143_vm0 = vcmask 130048   ;;  %s3000_s0 = inlined_call_operand.vmem [shape: f32[2,512,16], index: 0, kind: input, shape index: {}]   ;;  %s3001_s1 = inlined_call_operand.vmem [shape: f32[512,8], index: 1, kind: input, shape index: {}]   ;;  %s3002_s2 = inlined_call_operand.vmem [shape: f32[1,8], index: 2, kind: input, shape index: {}]   ;;  %s3003_s3 = inlined_call_operand.hbm [shape: f32[2,8], index: 3, kind: output, shape index: {}]  }
   0x1   :  { %v95_v0 = vld [vmem:[%s3000_s0 + $0x280] sm:$0xff]  ;;  %v96_v2 = vld [vmem:[%s3000_s0 + $0x288] sm:$0xff]  ;;  %v33_v13 = vld [vmem:[%s3000_s0 + $0x90] sm:$0xff] }
   0x2   :  { %v31_v1 = vld [vmem:[%s3000_s0 + $0x80] sm:$0xff]  ;;  %v384_v3 = vsel %vm143_vm0, %v95_v0, 0.0  ;;  %v32_v5 = vld [vmem:[%s3000_s0 + $0x88] sm:$0xff]  ;;  %v387_v6 = vsel %vm143_vm0, %v96_v2, 0.0  ;;  %v198_v15 = vsel %vm143_vm0, %v33_v13, 0.0  ;;  %v97_v16 = vld [vmem:[%s3000_s0 + $0x290] sm:$0xff] }
   0x3   :  { %v192_v4 = vsel %vm143_vm0, %v31_v1, 0.0  ;;  %385 = vadd.xlane.f32.xlu1 %v384_v3  ;;  %v195_v7 = vsel %vm143_vm0, %v32_v5, 0.0  ;;  %v16_v8 = vld [vmem:[%s3000_s0 + $0x8] sm:$0xff]  ;;  %v15_v9 = vld [vmem:[%s3000_s0] sm:$0xff]  ;;  %v390_v18 = vsel %vm143_vm0, %v97_v16, 0.0  ;;  %v34_v20 = vld [vmem:[%s3000_s0 + $0x98] sm:$0xff] }
   0x4   :  { %193 = vadd.xlane.f32.xlu0 %v192_v4  ;;  %v147_v10 = vsel %vm143_vm0, %v16_v8, 0.0  ;;  %v144_v11 = vsel %vm143_vm0, %v15_v9, 0.0  ;;  %v79_v12 = vld [vmem:[%s3000_s0 + $0x200] sm:$0xff]  ;;  %v80_v17 = vld [vmem:[%s3000_s0 + $0x208] sm:$0xff]  ;;  %v17_v21 = vld [vmem:[%s3000_s0 + $0x10] sm:$0xff]  ;;  %v201_v22 = vsel %vm143_vm0, %v34_v20, 0.0 }
   0x5   :  { %v336_v14 = vsel %vm143_vm0, %v79_v12, 0.0  ;;  %v339_v19 = vsel %vm143_vm0, %v80_v17, 0.0  ;;  %v150_v23 = vsel %vm143_vm0, %v17_v21, 0.0  ;;  %v64_v24 = vld [vmem:[%s3000_s0 + $0x188] sm:$0xff]  ;;  %v63_v25 = vld [vmem:[%s3000_s0 + $0x180] sm:$0xff]  ;;  %v98_v28 = vld [vmem:[%s3000_s0 + $0x298] sm:$0xff] }
   0x6   :  { %v291_v26 = vsel %vm143_vm0, %v64_v24, 0.0  ;;  %v288_v27 = vsel %vm143_vm0, %v63_v25, 0.0  ;;  %v81_v29 = vld [vmem:[%s3000_s0 + $0x210] sm:$0xff]  ;;  %v393_v30 = vsel %vm143_vm0, %v98_v28, 0.0 }
   0x7   :  { %388 = vadd.xlane.f32.xlu1 %v387_v6  ;;  %v342_v31 = vsel %vm143_vm0, %v81_v29, 0.0 }
   0x8   :  { %196 = vadd.xlane.f32.xlu0 %v195_v7 }
   0xb   :  { %148 = vadd.xlane.f32.xlu1 %v147_v10 }
   0xc   :  { %145 = vadd.xlane.f32.xlu0 %v144_v11 }
   0xf   :  { %337 = vadd.xlane.f32.xlu1 %v336_v14 }
  0x10   :  { %199 = vadd.xlane.f32.xlu0 %v198_v15 }
  0x13   :  { %391 = vadd.xlane.f32.xlu1 %v390_v18 }
  0x14   :  { %340 = vadd.xlane.f32.xlu0 %v339_v19 }
  0x17   :  { %202 = vadd.xlane.f32.xlu1 %v201_v22 }
  0x18   :  { %151 = vadd.xlane.f32.xlu0 %v150_v23 }
  0x1b   :  { %292 = vadd.xlane.f32.xlu1 %v291_v26 }
  0x1c   :  { %289 = vadd.xlane.f32.xlu0 %v288_v27 }
  0x1d   :  { %8 = vsyncpa [#allocation3], 0  ;;  %v128_v32 = vld [vmem:[%s3000_s0 + $0x388] sm:$0xff]  ;;  %v127_v33 = vld [vmem:[%s3000_s0 + $0x380] sm:$0xff]  ;;  %vm866_vm1 = vcmask 130112   ;;  %vm873_vm2 = vcmask 195712  }
  0x1e   :  { %v483_v34 = vsel %vm143_vm0, %v128_v32, 0.0  ;;  %v480_v35 = vsel %vm143_vm0, %v127_v33, 0.0  ;;  %v35_v36 = vld [vmem:[%s3000_s0 + $0xa0] sm:$0xff]  ;;  %v18_v37 = vld [vmem:[%s3000_s0 + $0x18] sm:$0xff]  ;;  %v48_v40 = vld [vmem:[%s3000_s0 + $0x108] sm:$0xff]  ;;  %vm880_vm3 = vcmask 261312  }
  0x1f   :  { %394 = vadd.xlane.f32.xlu1 %v393_v30  ;;  %v204_v38 = vsel %vm143_vm0, %v35_v36, 0.0  ;;  %v153_v39 = vsel %vm143_vm0, %v18_v37, 0.0  ;;  %v47_v41 = vld [vmem:[%s3000_s0 + $0x100] sm:$0xff]  ;;  %v243_v42 = vsel %vm143_vm0, %v48_v40, 0.0  ;;  %v82_v44 = vld [vmem:[%s3000_s0 + $0x218] sm:$0xff]  ;;  %v65_v45 = vld [vmem:[%s3000_s0 + $0x190] sm:$0xff] }
  0x20   :  { %343 = vadd.xlane.f32.xlu0 %v342_v31  ;;  %v240_v43 = vsel %vm143_vm0, %v47_v41, 0.0  ;;  %v345_v46 = vsel %vm143_vm0, %v82_v44, 0.0  ;;  %v294_v47 = vsel %vm143_vm0, %v65_v45, 0.0  ;;  %v111_v48 = vld [vmem:[%s3000_s0 + $0x300] sm:$0xff]  ;;  %v129_v52 = vld [vmem:[%s3000_s0 + $0x390] sm:$0xff]  ;;  %v112_v53 = vld [vmem:[%s3000_s0 + $0x308] sm:$0xff] }
  0x21   :  { %v99_v49 = vld [vmem:[%s3000_s0 + $0x2a0] sm:$0xff]  ;;  %v432_v50 = vsel %vm143_vm0, %v111_v48, 0.0  ;;  %v486_v54 = vsel %vm143_vm0, %v129_v52, 0.0  ;;  %v435_v55 = vsel %vm143_vm0, %v112_v53, 0.0  ;;  %v36_v56 = vld [vmem:[%s3000_s0 + $0xa8] sm:$0xff]  ;;  %v66_v60 = vld [vmem:[%s3000_s0 + $0x198] sm:$0xff] }
  0x22   :  { %v396_v51 = vsel %vm143_vm0, %v99_v49, 0.0  ;;  %v19_v57 = vld [vmem:[%s3000_s0 + $0x20] sm:$0xff]  ;;  %v207_v58 = vsel %vm143_vm0, %v36_v56, 0.0  ;;  %v49_v61 = vld [vmem:[%s3000_s0 + $0x110] sm:$0xff]  ;;  %v297_v62 = vsel %vm143_vm0, %v66_v60, 0.0  ;;  %v100_v0 = vld [vmem:[%s3000_s0 + $0x2a8] sm:$0xff] }
  0x23   :  { %484 = vadd.xlane.f32.xlu1 %v483_v34  ;;  %v156_v59 = vsel %vm143_vm0, %v19_v57, 0.0  ;;  %v246_v63 = vsel %vm143_vm0, %v49_v61, 0.0  ;;  %v83_v1 = vld [vmem:[%s3000_s0 + $0x220] sm:$0xff]  ;;  %v399_v2 = vsel %vm143_vm0, %v100_v0, 0.0  ;;  %v130_v4 = vld [vmem:[%s3000_s0 + $0x398] sm:$0xff]  ;;  %v113_v5 = vld [vmem:[%s3000_s0 + $0x310] sm:$0xff] }
  0x24   :  { %481 = vadd.xlane.f32.xlu0 %v480_v35  ;;  %v348_v3 = vsel %vm143_vm0, %v83_v1, 0.0  ;;  %v489_v6 = vsel %vm143_vm0, %v130_v4, 0.0  ;;  %v438_v7 = vsel %vm143_vm0, %v113_v5, 0.0  ;;  %v37_v8 = vld [vmem:[%s3000_s0 + $0xb0] sm:$0xff]  ;;  %v20_v9 = vld [vmem:[%s3000_s0 + $0x28] sm:$0xff]  ;;  %v67_v12 = vld [vmem:[%s3000_s0 + $0x1a0] sm:$0xff] }
  0x25   :  { %v210_v10 = vsel %vm143_vm0, %v37_v8, 0.0  ;;  %v159_v11 = vsel %vm143_vm0, %v20_v9, 0.0  ;;  %v50_v13 = vld [vmem:[%s3000_s0 + $0x118] sm:$0xff]  ;;  %v300_v14 = vsel %vm143_vm0, %v67_v12, 0.0  ;;  %v101_v16 = vld [vmem:[%s3000_s0 + $0x2b0] sm:$0xff]  ;;  %v84_v17 = vld [vmem:[%s3000_s0 + $0x228] sm:$0xff] }
  0x26   :  { %v249_v15 = vsel %vm143_vm0, %v50_v13, 0.0  ;;  %v402_v18 = vsel %vm143_vm0, %v101_v16, 0.0  ;;  %v351_v19 = vsel %vm143_vm0, %v84_v17, 0.0  ;;  %v131_v20 = vld [vmem:[%s3000_s0 + $0x3a0] sm:$0xff]  ;;  %v114_v21 = vld [vmem:[%s3000_s0 + $0x318] sm:$0xff]  ;;  %v21_v25 = vld [vmem:[%s3000_s0 + $0x30] sm:$0xff] }
  0x27   :  { %205 = vadd.xlane.f32.xlu1 %v204_v38  ;;  %v492_v22 = vsel %vm143_vm0, %v131_v20, 0.0  ;;  %v441_v23 = vsel %vm143_vm0, %v114_v21, 0.0  ;;  %v38_v24 = vld [vmem:[%s3000_s0 + $0xb8] sm:$0xff]  ;;  %v162_v27 = vsel %vm143_vm0, %v21_v25, 0.0  ;;  %v68_v28 = vld [vmem:[%s3000_s0 + $0x1a8] sm:$0xff]  ;;  %v51_v29 = vld [vmem:[%s3000_s0 + $0x120] sm:$0xff] }
  0x28   :  { %154 = vadd.xlane.f32.xlu0 %v153_v39  ;;  %v213_v26 = vsel %vm143_vm0, %v38_v24, 0.0  ;;  %v303_v30 = vsel %vm143_vm0, %v68_v28, 0.0  ;;  %v252_v31 = vsel %vm143_vm0, %v51_v29, 0.0  ;;  %v102_v32 = vld [vmem:[%s3000_s0 + $0x2b8] sm:$0xff]  ;;  %v85_v33 = vld [vmem:[%s3000_s0 + $0x230] sm:$0xff]  ;;  %v132_v36 = vld [vmem:[%s3000_s0 + $0x3a8] sm:$0xff] }
  0x29   :  { %v405_v34 = vsel %vm143_vm0, %v102_v32, 0.0  ;;  %v354_v35 = vsel %vm143_vm0, %v85_v33, 0.0  ;;  %v115_v37 = vld [vmem:[%s3000_s0 + $0x320] sm:$0xff]  ;;  %v495_v38 = vsel %vm143_vm0, %v132_v36, 0.0  ;;  %v22_v41 = vld [vmem:[%s3000_s0 + $0x38] sm:$0xff]  ;;  %v69_v44 = vld [vmem:[%s3000_s0 + $0x1b0] sm:$0xff] }
  0x2a   :  { %v444_v39 = vsel %vm143_vm0, %v115_v37, 0.0  ;;  %v39_v40 = vld [vmem:[%s3000_s0 + $0xc0] sm:$0xff]  ;;  %v52_v45 = vld [vmem:[%s3000_s0 + $0x128] sm:$0xff]  ;;  %v86_v49 = vld [vmem:[%s3000_s0 + $0x238] sm:$0xff]  ;;  %vm887_vm4 = vcmask 326912   ;;  %vm894_vm5 = vcmask 392512  }
  0x2b   :  { %244 = vadd.xlane.f32.xlu1 %v243_v42  ;;  %v216_v42 = vsel %vm143_vm0, %v39_v40, 0.0  ;;  %v103_v48 = vld [vmem:[%s3000_s0 + $0x2c0] sm:$0xff]  ;;  %v133_v52 = vld [vmem:[%s3000_s0 + $0x3b0] sm:$0xff]  ;;  %v116_v53 = vld [vmem:[%s3000_s0 + $0x328] sm:$0xff]  ;;  %vm901_vm6 = vcmask 458112   ;;  %vm908_vm7 = vcmask 523712  }
  0x2c   :  { %241 = vadd.xlane.f32.xlu0 %v240_v43  ;;  %v165_v43 = vsel %vm143_vm0, %v22_v41, 0.0  ;;  %v40_v56 = vld [vmem:[%s3000_s0 + $0xc8] sm:$0xff]  ;;  %v23_v57 = vld [vmem:[%s3000_s0 + $0x40] sm:$0xff]  ;;  %v70_v60 = vld [vmem:[%s3000_s0 + $0x1b8] sm:$0xff]  ;;  %vm915_vm8 = vcmask 589312   ;;  %vm922_vm9 = vcmask 654912  }
  0x2d   :  { %v53_v61 = vld [vmem:[%s3000_s0 + $0x130] sm:$0xff]  ;;  %v104_v0 = vld [vmem:[%s3000_s0 + $0x2c8] sm:$0xff]  ;;  %v87_v1 = vld [vmem:[%s3000_s0 + $0x240] sm:$0xff]  ;;  %vm929_vm10 = vcmask 720512   ;;  %vm936_vm11 = vcmask 786112   ;;  %vm943_vm12 = vcmask 851712  }
  0x2e   :  { %v134_v4 = vld [vmem:[%s3000_s0 + $0x3b8] sm:$0xff]  ;;  %v117_v5 = vld [vmem:[%s3000_s0 + $0x330] sm:$0xff]  ;;  %v24_v9 = vld [vmem:[%s3000_s0 + $0x48] sm:$0xff]  ;;  %vm950_vm13 = vcmask 917312   ;;  %vm957_vm14 = vcmask 982912   ;;  %vm964_vm15 = vcmask 1048512  }
  0x2f   :  { %346 = vadd.xlane.f32.xlu1 %v345_v46  ;;  %v306_v46 = vsel %vm143_vm0, %v69_v44, 0.0  ;;  %v41_v8 = vld [vmem:[%s3000_s0 + $0xd0] sm:$0xff]  ;;  %v171_v12 = vsel %vm143_vm0, %v24_v9, 0.0  ;;  %s1778_s16 = smov [#allocation2]  }
  0x30   :  { %295 = vadd.xlane.f32.xlu0 %v294_v47  ;;  %v255_v47 = vsel %vm143_vm0, %v52_v45, 0.0  ;;  %v89_v9 = vld [vmem:[%s3000_s0 + $0x250] sm:$0xff]  ;;  %s1676_s17 = sshll.u32 %s1778_s16, 4  ;;  %s1677_s17 = int_to_ptr.vmem [resolvable:$true] %s1676_s17 }
  0x31   :  { %s1756_s18 = scalar_lea.vmem %s1677_s17, 32  ;;  %p1761_p1 = scmp.lt.s32.totalorder %s1677_s17, %s1677_s17 }
  0x32   :  { %p1757_p0 = scmp.ne.s32.totalorder %s1677_s17, %s1756_s18  ;;  %p1762_p2 = scmp.lt.s32.totalorder %s1756_s18, %s1756_s18 }
  0x33   :  { %433 = vadd.xlane.f32.xlu1 %v432_v50  ;;  %v408_v50 = vsel %vm143_vm0, %v103_v48, 0.0 }
  0x34   :  { %397 = vadd.xlane.f32.xlu0 %v396_v51  ;;  %v357_v51 = vsel %vm143_vm0, %v86_v49, 0.0  ;;  %v42_v49 = vld [vmem:[%s3000_s0 + $0xd8] sm:$0xff]  ;;  %p1763_p3 = por %p1762_p2, %p1761_p1 }
  0x36   :  { %p1764_p4 = pnand %p1763_p3, %p1757_p0 }
  0x37   :  { %487 = vadd.xlane.f32.xlu1 %v486_v54  ;;  %v498_v54 = vsel %vm143_vm0, %v133_v52, 0.0 }
  0x38   :  { %436 = vadd.xlane.f32.xlu0 %v435_v55  ;;  %v447_v55 = vsel %vm143_vm0, %v116_v53, 0.0 }
  0x3b   :  { %208 = vadd.xlane.f32.xlu1 %v207_v58  ;;  %v219_v58 = vsel %vm143_vm0, %v40_v56, 0.0  ;;  %v225_v56 = vsel %vm143_vm0, %v42_v49, 0.0  ;;  %v73_v49 = vld [vmem:[%s3000_s0 + $0x1d0] sm:$0xff] }
  0x3c   :  { %157 = vadd.xlane.f32.xlu0 %v156_v59  ;;  %v168_v59 = vsel %vm143_vm0, %v23_v57, 0.0 }
  0x3f   :  { %298 = vadd.xlane.f32.xlu1 %v297_v62  ;;  %v309_v62 = vsel %vm143_vm0, %v70_v60, 0.0  ;;  %v72_v60 = vld [vmem:[%s3000_s0 + $0x1c8] sm:$0xff] }
  0x40   :  { %247 = vadd.xlane.f32.xlu0 %v246_v63  ;;  %v258_v63 = vsel %vm143_vm0, %v53_v61, 0.0  ;;  %v55_v61 = vld [vmem:[%s3000_s0 + $0x140] sm:$0xff] }
  0x43   :  { %400 = vadd.xlane.f32.xlu1 %v399_v2  ;;  %v411_v2 = vsel %vm143_vm0, %v104_v0, 0.0 }
  0x44   :  { %349 = vadd.xlane.f32.xlu0 %v348_v3  ;;  %v360_v3 = vsel %vm143_vm0, %v87_v1, 0.0 }
  0x47   :  { %490 = vadd.xlane.f32.xlu1 %v489_v6  ;;  %v501_v6 = vsel %vm143_vm0, %v134_v4, 0.0  ;;  %v264_v4 = vsel %vm143_vm0, %v55_v61, 0.0 }
  0x48   :  { %439 = vadd.xlane.f32.xlu0 %v438_v7  ;;  %v450_v7 = vsel %vm143_vm0, %v117_v5, 0.0 }
  0x4b   :  { %211 = vadd.xlane.f32.xlu1 %v210_v10  ;;  %v855_v10 = vlaneseq }
  0x4c   :  { %160 = vadd.xlane.f32.xlu0 %v159_v11  ;;  %v222_v11 = vsel %vm143_vm0, %v41_v8, 0.0  ;;  %v106_v8 = vld [vmem:[%s3000_s0 + $0x2d8] sm:$0xff] }
  0x4d   :  { %v2079_v13 = vand.u32 127, %v855_v10  ;;  %v2087_v16 = vshrl.u32 %v855_v10, 7 }
  0x4f   :  { %301 = vadd.xlane.f32.xlu1 %v300_v14  ;;  %v71_v14 = vld [vmem:[%s3000_s0 + $0x1c0] sm:$0xff]  ;;  %v861_v17 = vadd.s32 4294967288, %v2079_v13  ;;  %v2100_v24 = vsub.s32 %v2079_v13, %v2087_v16  ;;  %v868_v40 = vadd.s32 4294967280, %v2079_v13 }
  0x50   :  { %250 = vadd.xlane.f32.xlu0 %v249_v15  ;;  %v54_v15 = vld [vmem:[%s3000_s0 + $0x138] sm:$0xff]  ;;  %v312_v20 = vsel %vm143_vm0, %v71_v14, 0.0 }
  0x51   :  { %v261_v21 = vsel %vm143_vm0, %v54_v15, 0.0  ;;  %v2131_v53 = vsub.s32 %v868_v40, %v2087_v16 }
  0x53   :  { %403 = vadd.xlane.f32.xlu1 %v402_v18 }
  0x54   :  { %352 = vadd.xlane.f32.xlu0 %v351_v19 }
  0x57   :  { %493 = vadd.xlane.f32.xlu1 %v492_v22  ;;  %v105_v22 = vld [vmem:[%s3000_s0 + $0x2d0] sm:$0xff] }
  0x58   :  { %442 = vadd.xlane.f32.xlu0 %v441_v23  ;;  %v88_v23 = vld [vmem:[%s3000_s0 + $0x248] sm:$0xff] }
  0x5b   :  { %214 = vadd.xlane.f32.xlu1 %v213_v26 }
  0x5c   :  { %163 = vadd.xlane.f32.xlu0 %v162_v27  ;;  %v2103_v27 = vsub.s32 %v861_v17, %v2087_v16 }
  0x5f   :  { %304 = vadd.xlane.f32.xlu1 %v303_v30  ;;  %v414_v30 = vsel %vm143_vm0, %v105_v22, 0.0 }
  0x60   :  { %253 = vadd.xlane.f32.xlu0 %v252_v31  ;;  %v363_v31 = vsel %vm143_vm0, %v88_v23, 0.0 }
  0x63   :  { %406 = vadd.xlane.f32.xlu1 %v405_v34  ;;  %v135_v34 = vld [vmem:[%s3000_s0 + $0x3c0] sm:$0xff] }
  0x64   :  { %355 = vadd.xlane.f32.xlu0 %v354_v35  ;;  %v118_v35 = vld [vmem:[%s3000_s0 + $0x338] sm:$0xff] }
  0x65   :  { %v453_v44 = vsel %vm143_vm0, %v118_v35, 0.0 }
  0x67   :  { %496 = vadd.xlane.f32.xlu1 %v495_v38 }
  0x68   :  { %445 = vadd.xlane.f32.xlu0 %v444_v39 }
  0x6b   :  { %217 = vadd.xlane.f32.xlu1 %v216_v42 }
  0x6c   :  { %166 = vadd.xlane.f32.xlu0 %v165_v43  ;;  %v504_v43 = vsel %vm143_vm0, %v135_v34, 0.0 }
  0x6f   :  { %307 = vadd.xlane.f32.xlu1 %v306_v46 }
  0x70   :  { %256 = vadd.xlane.f32.xlu0 %v255_v47 }
  0x73   :  { %409 = vadd.xlane.f32.xlu1 %v408_v50  ;;  %v25_v50 = vld [vmem:[%s3000_s0 + $0x50] sm:$0xff] }
  0x74   :  { %358 = vadd.xlane.f32.xlu0 %v357_v51  ;;  %v174_v57 = vsel %vm143_vm0, %v25_v50, 0.0  ;;  %v56_v50 = vld [vmem:[%s3000_s0 + $0x148] sm:$0xff] }
  0x77   :  { %499 = vadd.xlane.f32.xlu1 %v498_v54 }
  0x78   :  { %448 = vadd.xlane.f32.xlu0 %v447_v55 }
  0x7b   :  { %220 = vadd.xlane.f32.xlu1 %v219_v58 }
  0x7c   :  { %169 = vadd.xlane.f32.xlu0 %v168_v59 }
  0x7f   :  { %310 = vadd.xlane.f32.xlu1 %v309_v62  ;;  %v875_v62 = vadd.s32 4294967272, %v2079_v13 }
  0x80   :  { %259 = vadd.xlane.f32.xlu0 %v258_v63 }
  0x81   :  { %v2154_v10 = vsub.s32 %v875_v62, %v2087_v16 }
  0x83   :  { %412 = vadd.xlane.f32.xlu1 %v411_v2 }
  0x84   :  { %361 = vadd.xlane.f32.xlu0 %v360_v3  ;;  %v315_v3 = vsel %vm143_vm0, %v72_v60, 0.0 }
  0x87   :  { %502 = vadd.xlane.f32.xlu1 %v501_v6 }
  0x88   :  { %451 = vadd.xlane.f32.xlu0 %v450_v7 }
  0x8b   :  { %223 = vadd.xlane.f32.xlu1 %v222_v11 }
  0x8c   :  { %172 = vadd.xlane.f32.xlu0 %v171_v12  ;;  %v386_v18 = vpop.xlane.xlu1 %385 }
  0x8d   :  { %v194_v19 = vpop.xlane.xlu0 %193  ;;  %v608_v25 = vmul.f32 0.0625, %v386_v18  ;;  %v417_v18 = vsel %vm143_vm0, %v106_v8, 0.0 }
  0x8e   :  { %v544_v26 = vmul.f32 0.0625, %v194_v19  ;;  %v366_v19 = vsel %vm143_vm0, %v89_v9, 0.0 }
  0x8f   :  { %313 = vadd.xlane.f32.xlu1 %v312_v20  ;;  %v1285_v36 = vrot.slane %v608_v25, %v2100_v24  ;;  %v136_v25 = vld [vmem:[%s3000_s0 + $0x3c8] sm:$0xff] }
  0x90   :  { %262 = vadd.xlane.f32.xlu0 %v261_v21  ;;  %v389_v28 = vpop.xlane.xlu1 %388  ;;  %v969_v37 = vrot.slane %v544_v26, %v2100_v24  ;;  %v119_v26 = vld [vmem:[%s3000_s0 + $0x340] sm:$0xff] }
  0x91   :  { %v197_v29 = vpop.xlane.xlu0 %196  ;;  %v609_v32 = vmul.f32 0.0625, %v389_v28 }
  0x92   :  { %v545_v33 = vmul.f32 0.0625, %v197_v29 }
  0x93   :  { %v1289_v38 = vrot.slane %v609_v32, %v2103_v27  ;;  %415 = vadd.xlane.f32.xlu1 %v414_v30  ;;  %v507_v32 = vsel %vm143_vm0, %v136_v25, 0.0 }
  0x94   :  { %v973_v39 = vrot.slane %v545_v33, %v2103_v27  ;;  %364 = vadd.xlane.f32.xlu0 %v363_v31  ;;  %v149_v41 = vpop.xlane.xlu1 %148  ;;  %v456_v33 = vsel %vm143_vm0, %v119_v26, 0.0 }
  0x95   :  { %v146_v42 = vpop.xlane.xlu0 %145  ;;  %v1290_v45 = vsel %vm866_vm1, %v1289_v38, %v1285_v36  ;;  %v529_v47 = vmul.f32 0.0625, %v149_v41  ;;  %v43_v38 = vld [vmem:[%s3000_s0 + $0xe0] sm:$0xff] }
  0x96   :  { %v974_v46 = vsel %vm866_vm1, %v973_v39, %v969_v37  ;;  %v528_v48 = vmul.f32 0.0625, %v146_v42  ;;  %v26_v39 = vld [vmem:[%s3000_s0 + $0x58] sm:$0xff] }
  0x97   :  { %v865_v51 = vrot.slane %v529_v47, %v2103_v27  ;;  %505 = vadd.xlane.f32.xlu1 %v504_v43 }
  0x98   :  { %v860_v52 = vrot.slane %v528_v48, %v2100_v24  ;;  %454 = vadd.xlane.f32.xlu0 %v453_v44  ;;  %v338_v54 = vpop.xlane.xlu1 %337  ;;  %v228_v44 = vsel %vm143_vm0, %v43_v38, 0.0 }
  0x99   :  { %v200_v55 = vpop.xlane.xlu0 %199  ;;  %v592_v63 = vmul.f32 0.0625, %v338_v54  ;;  %v882_v54 = vadd.s32 4294967264, %v2079_v13 }
  0x9a   :  { %v867_v58 = vsel %vm866_vm1, %v865_v51, %v860_v52  ;;  %v546_v59 = vmul.f32 0.0625, %v200_v55 }
  0x9b   :  { %226 = vadd.xlane.f32.xlu1 %v225_v56  ;;  %v1206_v11 = vrot.slane %v592_v63, %v2100_v24  ;;  %v107_v63 = vld [vmem:[%s3000_s0 + $0x2e0] sm:$0xff] }
  0x9c   :  { %v978_v0 = vrot.slane %v546_v59, %v2131_v53  ;;  %175 = vadd.xlane.f32.xlu0 %v174_v57  ;;  %v392_v1 = vpop.xlane.xlu1 %391  ;;  %v318_v57 = vsel %vm143_vm0, %v73_v49, 0.0 }
  0x9d   :  { %v341_v2 = vpop.xlane.xlu0 %340  ;;  %v610_v6 = vmul.f32 0.0625, %v392_v1 }
  0x9e   :  { %v979_v5 = vsel %vm873_vm2, %v978_v0, %v974_v46  ;;  %v593_v7 = vmul.f32 0.0625, %v341_v2  ;;  %v90_v0 = vld [vmem:[%s3000_s0 + $0x258] sm:$0xff] }
  0x9f   :  { %v1294_v12 = vrot.slane %v610_v6, %v2131_v53  ;;  %316 = vadd.xlane.f32.xlu1 %v315_v3  ;;  %v2212_v3 = vsub.s32 %v882_v54, %v2087_v16  ;;  %v420_v6 = vsel %vm143_vm0, %v107_v63, 0.0  ;;  %v889_v54 = vadd.s32 4294967256, %v2079_v13 }
  0xa0   :  { %v1210_v14 = vrot.slane %v593_v7, %v2103_v27  ;;  %265 = vadd.xlane.f32.xlu0 %v264_v4  ;;  %v203_v15 = vpop.xlane.xlu1 %202  ;;  %v369_v7 = vsel %vm143_vm0, %v90_v0, 0.0  ;;  %v138_v0 = vld [vmem:[%s3000_s0 + $0x3d8] sm:$0xff] }
  0xa1   :  { %v152_v17 = vpop.xlane.xlu0 %151  ;;  %v1295_v20 = vsel %vm873_vm2, %v1294_v12, %v1290_v45  ;;  %v547_v22 = vmul.f32 0.0625, %v203_v15  ;;  %v177_v45 = vsel %vm143_vm0, %v26_v39, 0.0  ;;  %v137_v12 = vld [vmem:[%s3000_s0 + $0x3d0] sm:$0xff]  ;;  %v74_v39 = vld [vmem:[%s3000_s0 + $0x1d8] sm:$0xff] }
  0xa2   :  { %v1211_v21 = vsel %vm866_vm1, %v1210_v14, %v1206_v11  ;;  %v530_v23 = vmul.f32 0.0625, %v152_v17  ;;  %v120_v14 = vld [vmem:[%s3000_s0 + $0x348] sm:$0xff] }
  0xa3   :  { %v983_v28 = vrot.slane %v547_v22, %v2154_v10  ;;  %418 = vadd.xlane.f32.xlu1 %v417_v18 }
  0xa4   :  { %v872_v29 = vrot.slane %v530_v23, %v2131_v53  ;;  %367 = vadd.xlane.f32.xlu0 %v366_v19  ;;  %v293_v30 = vpop.xlane.xlu1 %292 }
  0xa5   :  { %v290_v31 = vpop.xlane.xlu0 %289  ;;  %v984_v34 = vsel %vm880_vm3, %v983_v28, %v979_v5  ;;  %v577_v36 = vmul.f32 0.0625, %v293_v30  ;;  %v44_v28 = vld [vmem:[%s3000_s0 + $0xe8] sm:$0xff] }
  0xa6   :  { %v874_v35 = vsel %vm873_vm2, %v872_v29, %v867_v58  ;;  %v576_v37 = vmul.f32 0.0625, %v290_v31  ;;  %v267_v58 = vsel %vm143_vm0, %v56_v50, 0.0  ;;  %v27_v29 = vld [vmem:[%s3000_s0 + $0x60] sm:$0xff] }
  0xa7   :  { %v1131_v40 = vrot.slane %v577_v36, %v2103_v27  ;;  %508 = vadd.xlane.f32.xlu1 %v507_v32 }
  0xa8   :  { %v1127_v41 = vrot.slane %v576_v37, %v2100_v24  ;;  %457 = vadd.xlane.f32.xlu0 %v456_v33  ;;  %v395_v42 = vpop.xlane.xlu1 %394 }
  0xa9   :  { %v344_v43 = vpop.xlane.xlu0 %343  ;;  %v611_v47 = vmul.f32 0.0625, %v395_v42 }
  0xaa   :  { %v2186_v46 = vsel %vm866_vm1, %v1131_v40, %v1127_v41  ;;  %v594_v48 = vmul.f32 0.0625, %v344_v43  ;;  %v57_v40 = vld [vmem:[%s3000_s0 + $0x150] sm:$0xff] }
  0xab   :  { %v1299_v51 = vrot.slane %v611_v47, %v2154_v10  ;;  %229 = vadd.xlane.f32.xlu1 %v228_v44  ;;  %v270_v47 = vsel %vm143_vm0, %v57_v40, 0.0 }
  0xac   :  { %v1215_v52 = vrot.slane %v594_v48, %v2131_v53  ;;  %178 = vadd.xlane.f32.xlu0 %v177_v45  ;;  %v485_v55 = vpop.xlane.xlu1 %484  ;;  %v321_v45 = vsel %vm143_vm0, %v74_v39, 0.0 }
  0xad   :  { %v482_v56 = vpop.xlane.xlu0 %481  ;;  %v2200_v59 = vsel %vm880_vm3, %v1299_v51, %v1295_v20  ;;  %v641_v61 = vmul.f32 0.0625, %v485_v55  ;;  %v510_v20 = vsel %vm143_vm0, %v137_v12, 0.0  ;;  %v108_v51 = vld [vmem:[%s3000_s0 + $0x2e8] sm:$0xff] }
  0xae   :  { %v1216_v60 = vsel %vm873_vm2, %v1215_v52, %v1211_v21  ;;  %v640_v62 = vmul.f32 0.0625, %v482_v56  ;;  %v459_v21 = vsel %vm143_vm0, %v120_v14, 0.0  ;;  %v91_v52 = vld [vmem:[%s3000_s0 + $0x260] sm:$0xff] }
  0xaf   :  { %v1447_v1 = vrot.slane %v641_v61, %v2103_v27  ;;  %319 = vadd.xlane.f32.xlu1 %v318_v57 }
  0xb0   :  { %v1443_v2 = vrot.slane %v640_v62, %v2100_v24  ;;  %268 = vadd.xlane.f32.xlu0 %v267_v58  ;;  %v206_v4 = vpop.xlane.xlu1 %205 }
  0xb1   :  { %v155_v5 = vpop.xlane.xlu0 %154  ;;  %v548_v9 = vmul.f32 0.0625, %v206_v4 }
  0xb2   :  { %v2217_v8 = vsel %vm866_vm1, %v1447_v1, %v1443_v2  ;;  %v531_v11 = vmul.f32 0.0625, %v155_v5  ;;  %v121_v1 = vld [vmem:[%s3000_s0 + $0x350] sm:$0xff]  ;;  %v2282_v2 = vsub.s32 %v889_v54, %v2087_v16 }
  0xb3   :  { %v988_v15 = vrot.slane %v548_v9, %v2212_v3  ;;  %421 = vadd.xlane.f32.xlu1 %v420_v6  ;;  %v513_v9 = vsel %vm143_vm0, %v138_v0, 0.0 }
  0xb4   :  { %v879_v17 = vrot.slane %v531_v11, %v2154_v10  ;;  %370 = vadd.xlane.f32.xlu0 %v369_v7  ;;  %v245_v18 = vpop.xlane.xlu1 %244  ;;  %v462_v11 = vsel %vm143_vm0, %v121_v1, 0.0 }
  0xb5   :  { %v242_v19 = vpop.xlane.xlu0 %241  ;;  %v2230_v22 = vsel %vm887_vm4, %v988_v15, %v984_v34  ;;  %v561_v25 = vmul.f32 0.0625, %v245_v18  ;;  %v231_v34 = vsel %vm143_vm0, %v44_v28, 0.0 }
  0xb6   :  { %v2233_v23 = vsel %vm880_vm3, %v879_v17, %v874_v35  ;;  %v560_v26 = vmul.f32 0.0625, %v242_v19  ;;  %v180_v35 = vsel %vm143_vm0, %v27_v29, 0.0 }
  0xb7   :  { %v1052_v30 = vrot.slane %v561_v25, %v2103_v27  ;;  %511 = vadd.xlane.f32.xlu1 %v510_v20 }
  0xb8   :  { %v1048_v31 = vrot.slane %v560_v26, %v2100_v24  ;;  %460 = vadd.xlane.f32.xlu0 %v459_v21  ;;  %v347_v32 = vpop.xlane.xlu1 %346 }
  0xb9   :  { %v296_v33 = vpop.xlane.xlu0 %295  ;;  %v595_v37 = vmul.f32 0.0625, %v347_v32  ;;  %v58_v32 = vld [vmem:[%s3000_s0 + $0x158] sm:$0xff] }
  0xba   :  { %v2246_v36 = vsel %vm866_vm1, %v1052_v30, %v1048_v31  ;;  %v578_v38 = vmul.f32 0.0625, %v296_v33  ;;  %v75_v31 = vld [vmem:[%s3000_s0 + $0x1e0] sm:$0xff] }
  0xbb   :  { %v1220_v41 = vrot.slane %v595_v37, %v2154_v10  ;;  %232 = vadd.xlane.f32.xlu1 %v231_v34  ;;  %v273_v37 = vsel %vm143_vm0, %v58_v32, 0.0 }
  0xbc   :  { %v1136_v42 = vrot.slane %v578_v38, %v2131_v53  ;;  %181 = vadd.xlane.f32.xlu0 %v180_v35  ;;  %v434_v43 = vpop.xlane.xlu1 %433 }
  0xbd   :  { %v398_v44 = vpop.xlane.xlu0 %397  ;;  %v2259_v48 = vsel %vm880_vm3, %v1220_v41, %v1216_v60  ;;  %v624_v55 = vmul.f32 0.0625, %v434_v43  ;;  %v372_v60 = vsel %vm143_vm0, %v91_v52, 0.0  ;;  %v92_v43 = vld [vmem:[%s3000_s0 + $0x268] sm:$0xff] }
  0xbe   :  { %v1137_v49 = vsel %vm873_vm2, %v1136_v42, %v2186_v46  ;;  %v612_v50 = vmul.f32 0.0625, %v398_v44  ;;  %v423_v46 = vsel %vm143_vm0, %v108_v51, 0.0  ;;  %v109_v42 = vld [vmem:[%s3000_s0 + $0x2f0] sm:$0xff]  ;;  %v375_v51 = vsel %vm143_vm0, %v92_v43, 0.0 }
  0xbf   :  { %322 = vadd.xlane.f32.xlu1 %v321_v45  ;;  %v1364_v4 = vrot.slane %v624_v55, %v2100_v24  ;;  %v45_v24 = vld [vmem:[%s3000_s0 + $0xf0] sm:$0xff] }
  0xc0   :  { %v1304_v56 = vrot.slane %v612_v50, %v2212_v3  ;;  %271 = vadd.xlane.f32.xlu0 %v270_v47  ;;  %v488_v57 = vpop.xlane.xlu1 %487  ;;  %v234_v21 = vsel %vm143_vm0, %v45_v24, 0.0  ;;  %v896_v47 = vadd.s32 4294967248, %v2079_v13  ;;  %v426_v50 = vsel %vm143_vm0, %v109_v42, 0.0 }
  0xc1   :  { %v437_v58 = vpop.xlane.xlu0 %436  ;;  %v642_v62 = vmul.f32 0.0625, %v488_v57  ;;  %v139_v57 = vld [vmem:[%s3000_s0 + $0x3e0] sm:$0xff] }
  0xc2   :  { %v1305_v61 = vsel %vm887_vm4, %v1304_v56, %v2200_v59  ;;  %v625_v63 = vmul.f32 0.0625, %v437_v58  ;;  %v122_v58 = vld [vmem:[%s3000_s0 + $0x358] sm:$0xff] }
  0xc3   :  { %v1452_v5 = vrot.slane %v642_v62, %v2131_v53  ;;  %424 = vadd.xlane.f32.xlu1 %v423_v46  ;;  %v465_v0 = vsel %vm143_vm0, %v122_v58, 0.0  ;;  %v669_v58 = vld [vmem:[%s3001_s1 + $0x68] sm:$0xff] }
  0xc4   :  { %v1368_v6 = vrot.slane %v625_v63, %v2103_v27  ;;  %373 = vadd.xlane.f32.xlu0 %v372_v60  ;;  %v209_v59 = vpop.xlane.xlu1 %208  ;;  %v28_v27 = vld [vmem:[%s3000_s0 + $0x68] sm:$0xff]  ;;  %v516_v63 = vsel %vm143_vm0, %v139_v57, 0.0 }
  0xc5   :  { %v158_v7 = vpop.xlane.xlu0 %157  ;;  %v1453_v12 = vsel %vm873_vm2, %v1452_v5, %v2217_v8  ;;  %v549_v15 = vmul.f32 0.0625, %v209_v59  ;;  %v183_v25 = vsel %vm143_vm0, %v28_v27, 0.0  ;;  %v29_v59 = vld [vmem:[%s3000_s0 + $0x70] sm:$0xff] }
  0xc6   :  { %v1369_v14 = vsel %vm866_vm1, %v1368_v6, %v1364_v4  ;;  %v532_v17 = vmul.f32 0.0625, %v158_v7  ;;  %vm1668_vm1 = vcmask 58368  }
  0xc7   :  { %v993_v18 = vrot.slane %v549_v15, %v2282_v2  ;;  %514 = vadd.xlane.f32.xlu1 %v513_v9  ;;  %v186_v15 = vsel %vm143_vm0, %v29_v59, 0.0 }
  0xc8   :  { %v886_v19 = vrot.slane %v532_v17, %v2212_v3  ;;  %463 = vadd.xlane.f32.xlu0 %v462_v11  ;;  %v299_v8 = vpop.xlane.xlu1 %298 }
  0xc9   :  { %v248_v20 = vpop.xlane.xlu0 %247  ;;  %v994_v26 = vsel %vm894_vm5, %v993_v18, %v2230_v22  ;;  %v579_v29 = vmul.f32 0.0625, %v299_v8  ;;  %v59_v8 = vld [vmem:[%s3000_s0 + $0x160] sm:$0xff] }
  0xca   :  { %v888_v28 = vsel %vm887_vm4, %v886_v19, %v2233_v23  ;;  %v562_v30 = vmul.f32 0.0625, %v248_v20  ;;  %v324_v23 = vsel %vm143_vm0, %v75_v31, 0.0  ;;  %v76_v19 = vld [vmem:[%s3000_s0 + $0x1e8] sm:$0xff] }
  0xcb   :  { %v1141_v33 = vrot.slane %v579_v29, %v2154_v10  ;;  %235 = vadd.xlane.f32.xlu1 %v234_v21  ;;  %v276_v29 = vsel %vm143_vm0, %v59_v8, 0.0 }
  0xcc   :  { %v1057_v34 = vrot.slane %v562_v30, %v2131_v53  ;;  %184 = vadd.xlane.f32.xlu0 %v183_v25  ;;  %v401_v22 = vpop.xlane.xlu1 %400 }
  0xcd   :  { %v350_v35 = vpop.xlane.xlu0 %349  ;;  %v1142_v38 = vsel %vm880_vm3, %v1141_v33, %v1137_v49  ;;  %v613_v40 = vmul.f32 0.0625, %v401_v22  ;;  %v93_v22 = vld [vmem:[%s3000_s0 + $0x270] sm:$0xff] }
  0xce   :  { %v1058_v39 = vsel %vm873_vm2, %v1057_v34, %v2246_v36  ;;  %v596_v41 = vmul.f32 0.0625, %v350_v35  ;;  %v110_v34 = vld [vmem:[%s3000_s0 + $0x2f8] sm:$0xff]  ;;  %v378_v43 = vsel %vm143_vm0, %v93_v22, 0.0 }
  0xcf   :  { %v1309_v44 = vrot.slane %v613_v40, %v2282_v2  ;;  %325 = vadd.xlane.f32.xlu1 %v324_v23  ;;  %v687_v35 = vld [vmem:[%s3001_s1 + $0xf8] sm:$0xff]  ;;  %v429_v42 = vsel %vm143_vm0, %v110_v34, 0.0 }
  0xd0   :  { %v1225_v45 = vrot.slane %v596_v41, %v2212_v3  ;;  %274 = vadd.xlane.f32.xlu0 %v273_v37  ;;  %v491_v49 = vpop.xlane.xlu1 %490  ;;  %1685 = vmatprep.subr.mxu0 %v687_v35 }
  0xd1   :  { %v440_v36 = vpop.xlane.xlu0 %439  ;;  %v2331_v52 = vsel %vm894_vm5, %v1309_v44, %v1305_v61  ;;  %v643_v55 = vmul.f32 0.0625, %v491_v49  ;;  %v2346_v61 = vsub.s32 %v896_v47, %v2087_v16  ;;  %v686_v44 = vld [vmem:[%s3001_s1 + $0xf0] sm:$0xff] }
  0xd2   :  { %v2335_v54 = vsel %vm887_vm4, %v1225_v45, %v2259_v48  ;;  %v626_v56 = vmul.f32 0.0625, %v440_v36 }
  0xd3   :  { %v1457_v46 = vrot.slane %v643_v55, %v2154_v10  ;;  %427 = vadd.xlane.f32.xlu1 %v426_v50  ;;  %v140_v50 = vld [vmem:[%s3000_s0 + $0x3e8] sm:$0xff] }
  0xd4   :  { %v1373_v60 = vrot.slane %v626_v56, %v2131_v53  ;;  %376 = vadd.xlane.f32.xlu0 %v375_v51  ;;  %v212_v48 = vpop.xlane.xlu1 %211  ;;  %v46_v53 = vld [vmem:[%s3000_s0 + $0xf8] sm:$0xff]  ;;  %v123_v51 = vld [vmem:[%s3000_s0 + $0x360] sm:$0xff] }
  0xd5   :  { %v161_v62 = vpop.xlane.xlu0 %160  ;;  %v2351_v1 = vsel %vm880_vm3, %v1457_v46, %v1453_v12  ;;  %v550_v5 = vmul.f32 0.0625, %v212_v48  ;;  %v519_v48 = vsel %vm143_vm0, %v140_v50, 0.0 }
  0xd6   :  { %v2354_v4 = vsel %vm873_vm2, %v1373_v60, %v1369_v14  ;;  %v533_v6 = vmul.f32 0.0625, %v161_v62  ;;  %v237_v14 = vsel %vm143_vm0, %v46_v53, 0.0  ;;  %v468_v62 = vsel %vm143_vm0, %v123_v51, 0.0  ;;  %v30_v53 = vld [vmem:[%s3000_s0 + $0x78] sm:$0xff] }
  0xd7   :  { %v998_v7 = vrot.slane %v550_v5, %v2346_v61  ;;  %517 = vadd.xlane.f32.xlu1 %v516_v63 }
  0xd8   :  { %v893_v9 = vrot.slane %v533_v6, %v2282_v2  ;;  %466 = vadd.xlane.f32.xlu0 %v465_v0  ;;  %v302_v11 = vpop.xlane.xlu1 %301  ;;  %v60_v6 = vld [vmem:[%s3000_s0 + $0x168] sm:$0xff] }
  0xd9   :  { %v251_v12 = vpop.xlane.xlu0 %250  ;;  %v2367_v17 = vsel %vm901_vm6, %v998_v7, %v994_v26  ;;  %v580_v27 = vmul.f32 0.0625, %v302_v11 }
  0xda   :  { %v2370_v24 = vsel %vm894_vm5, %v893_v9, %v888_v28  ;;  %v563_v18 = vmul.f32 0.0625, %v251_v12  ;;  %v327_v28 = vsel %vm143_vm0, %v76_v19, 0.0  ;;  %v683_v9 = vld [vmem:[%s3001_s1 + $0xd8] sm:$0xff] }
  0xdb   :  { %v1146_v20 = vrot.slane %v580_v27, %v2212_v3  ;;  %238 = vadd.xlane.f32.xlu1 %v237_v14  ;;  %v279_v14 = vsel %vm143_vm0, %v60_v6, 0.0 }
  0xdc   :  { %v1062_v21 = vrot.slane %v563_v18, %v2154_v10  ;;  %187 = vadd.xlane.f32.xlu0 %v186_v15  ;;  %v404_v25 = vpop.xlane.xlu1 %403  ;;  %v189_v15 = vsel %vm143_vm0, %v30_v53, 0.0 }
  0xdd   :  { %v353_v26 = vpop.xlane.xlu0 %352  ;;  %v2383_v30 = vsel %vm887_vm4, %v1146_v20, %v1142_v38  ;;  %v614_v32 = vmul.f32 0.0625, %v404_v25  ;;  %v903_v38 = vadd.s32 4294967240, %v2079_v13  ;;  %v94_v20 = vld [vmem:[%s3000_s0 + $0x278] sm:$0xff] }
  0xde   :  { %v2386_v31 = vsel %vm880_vm3, %v1062_v21, %v1058_v39  ;;  %v597_v33 = vmul.f32 0.0625, %v353_v26  ;;  %v671_v39 = vld [vmem:[%s3001_s1 + $0x78] sm:$0xff]  ;;  %v77_v21 = vld [vmem:[%s3000_s0 + $0x1f0] sm:$0xff] }
  0xdf   :  { %v1314_v23 = vrot.slane %v614_v32, %v2346_v61  ;;  %328 = vadd.xlane.f32.xlu1 %v327_v28  ;;  %1686 = vmatpush3.msra.mxu0 %v671_v39  ;;  %v2431_v57 = vsub.s32 %v903_v38, %v2087_v16  ;;  %v666_v28 = vld [vmem:[%s3001_s1 + $0x50] sm:$0xff]  ;;  %v330_v34 = vsel %vm143_vm0, %v77_v21, 0.0  ;;  %v124_v39 = vld [vmem:[%s3000_s0 + $0x368] sm:$0xff]  ;;  %v700_v21 = vld [vmem:[%s3001_s1 + $0x160] sm:$0xff] }
  0xe0   :  { %v1230_v37 = vrot.slane %v597_v33, %v2282_v2  ;;  %277 = vadd.xlane.f32.xlu0 %v276_v29  ;;  %v494_v40 = vpop.xlane.xlu1 %493  ;;  %1687 = vmatprep.subr.mxu0 %v686_v44  ;;  %v381_v33 = vsel %vm143_vm0, %v94_v20, 0.0  ;;  %v141_v38 = vld [vmem:[%s3000_s0 + $0x3f0] sm:$0xff]  ;;  %v680_v44 = vld [vmem:[%s3001_s1 + $0xc0] sm:$0xff] }
  0xe1   :  { %v443_v41 = vpop.xlane.xlu0 %442  ;;  %v2410_v45 = vsel %vm901_vm6, %v1314_v23, %v2331_v52  ;;  %v644_v49 = vmul.f32 0.0625, %v494_v40  ;;  %v670_v52 = vld [vmem:[%s3001_s1 + $0x70] sm:$0xff]  ;;  %v719_v40 = vld [vmem:[%s3001_s1 + $0x1f8] sm:$0xff]  ;;  %v522_v51 = vsel %vm143_vm0, %v141_v38, 0.0 }
  0xe2   :  { %v2414_v47 = vsel %vm894_vm5, %v1230_v37, %v2335_v54  ;;  %v627_v36 = vmul.f32 0.0625, %v443_v41  ;;  %v685_v54 = vld [vmem:[%s3001_s1 + $0xe8] sm:$0xff]  ;;  %1688 = vmatpush3.msra.mxu0 %v670_v52  ;;  %v471_v52 = vsel %vm143_vm0, %v124_v39, 0.0  ;;  %1720 = vmatprep.subr.mxu1 %v719_v40  ;;  %v678_v20 = vld [vmem:[%s3001_s1 + $0xb0] sm:$0xff] }
  0xe3   :  { %v1462_v55 = vrot.slane %v644_v49, %v2212_v3  ;;  %430 = vadd.xlane.f32.xlu1 %v429_v42  ;;  %1689 = vmatprep.subr.mxu0 %v685_v54  ;;  %v703_v49 = vld [vmem:[%s3001_s1 + $0x178] sm:$0xff]  ;;  %v714_v40 = vld [vmem:[%s3001_s1 + $0x1d0] sm:$0xff] }
  0xe4   :  { %v1378_v56 = vrot.slane %v627_v36, %v2154_v10  ;;  %379 = vadd.xlane.f32.xlu0 %v378_v43  ;;  %v215_v46 = vpop.xlane.xlu1 %214  ;;  %1690 = vmatpush3.msra.mxu0 %v669_v58  ;;  %v910_v43 = vadd.s32 4294967232, %v2079_v13  ;;  %v78_v54 = vld [vmem:[%s3000_s0 + $0x1f8] sm:$0xff] }
  0xe5   :  { %v164_v60 = vpop.xlane.xlu0 %163  ;;  %v2440_v63 = vsel %vm887_vm4, %v1462_v55, %v2351_v1  ;;  %v551_v0 = vmul.f32 0.0625, %v215_v46  ;;  %v684_v1 = vld [vmem:[%s3001_s1 + $0xe0] sm:$0xff]  ;;  %v718_v55 = vld [vmem:[%s3001_s1 + $0x1f0] sm:$0xff]  ;;  %1721 = vmatpush3.msra.mxu1 %v703_v49 }
  0xe6   :  { %v2444_v10 = vsel %vm880_vm3, %v1378_v56, %v2354_v4  ;;  %v534_v5 = vmul.f32 0.0625, %v164_v60  ;;  %v668_v4 = vld [vmem:[%s3001_s1 + $0x60] sm:$0xff]  ;;  %1691 = vmatprep.subr.mxu0 %v684_v1  ;;  %1722 = vmatprep.subr.mxu1 %v718_v55  ;;  %v2558_v53 = vsub.s32 %v910_v43, %v2087_v16  ;;  %v663_v1 = vld [vmem:[%s3001_s1 + $0x38] sm:$0xff] }
  0xe7   :  { %v1003_v59 = vrot.slane %v551_v0, %v2431_v57  ;;  %520 = vadd.xlane.f32.xlu1 %v519_v48  ;;  %1692 = vmatpush3.msra.mxu0 %v668_v4  ;;  %v61_v48 = vld [vmem:[%s3000_s0 + $0x170] sm:$0xff]  ;;  %v717_v0 = vld [vmem:[%s3001_s1 + $0x1e8] sm:$0xff]  ;;  %v660_v43 = vld [vmem:[%s3001_s1 + $0x20] sm:$0xff] }
  0xe8   :  { %v900_v7 = vrot.slane %v534_v5, %v2346_v61  ;;  %469 = vadd.xlane.f32.xlu0 %v468_v62  ;;  %v305_v11 = vpop.xlane.xlu1 %304  ;;  %1693 = vmatprep.subr.mxu0 %v683_v9  ;;  %v664_v62 = vld [vmem:[%s3001_s1 + $0x40] sm:$0xff]  ;;  %v701_v4 = vld [vmem:[%s3001_s1 + $0x168] sm:$0xff]  ;;  %v333_v9 = vsel %vm143_vm0, %v78_v54, 0.0 }
  0xe9   :  { %v254_v12 = vpop.xlane.xlu0 %253  ;;  %v2467_v27 = vsel %vm908_vm7, %v1003_v59, %v2367_v17  ;;  %v581_v19 = vmul.f32 0.0625, %v305_v11  ;;  %v667_v17 = vld [vmem:[%s3001_s1 + $0x58] sm:$0xff]  ;;  %v282_v11 = vsel %vm143_vm0, %v61_v48, 0.0  ;;  %v713_v48 = vld [vmem:[%s3001_s1 + $0x1c8] sm:$0xff] }
  0xea   :  { %v2471_v18 = vsel %vm901_vm6, %v900_v7, %v2370_v24  ;;  %v564_v8 = vmul.f32 0.0625, %v254_v12  ;;  %v682_v24 = vld [vmem:[%s3001_s1 + $0xd0] sm:$0xff]  ;;  %1694 = vmatpush3.msra.mxu0 %v667_v17 }
  0xeb   :  { %v1151_v25 = vrot.slane %v581_v19, %v2282_v2  ;;  %280 = vadd.xlane.f32.xlu1 %v279_v14  ;;  %1695 = vmatprep.subr.mxu0 %v682_v24 }
  0xec   :  { %v1067_v26 = vrot.slane %v564_v8, %v2212_v3  ;;  %190 = vadd.xlane.f32.xlu0 %v189_v15  ;;  %v407_v29 = vpop.xlane.xlu1 %406  ;;  %1696 = vmatpush3.msra.mxu0 %v666_v28  ;;  %v125_v8 = vld [vmem:[%s3000_s0 + $0x370] sm:$0xff] }
  0xed   :  { %v356_v32 = vpop.xlane.xlu0 %355  ;;  %v2494_v22 = vsel %vm894_vm5, %v1151_v25, %v2383_v30  ;;  %v615_v23 = vmul.f32 0.0625, %v407_v29  ;;  %v681_v30 = vld [vmem:[%s3001_s1 + $0xc8] sm:$0xff] }
  0xee   :  { %v2498_v35 = vsel %vm887_vm4, %v1067_v26, %v2386_v31  ;;  %v598_v37 = vmul.f32 0.0625, %v356_v32  ;;  %v665_v31 = vld [vmem:[%s3001_s1 + $0x48] sm:$0xff]  ;;  %1697 = vmatprep.subr.mxu0 %v681_v30  ;;  %v715_v26 = vld [vmem:[%s3001_s1 + $0x1d8] sm:$0xff] }
  0xef   :  { %v1319_v41 = vrot.slane %v615_v23, %v2431_v57  ;;  %382 = vadd.xlane.f32.xlu1 %v381_v33  ;;  %1698 = vmatpush3.msra.mxu0 %v665_v31  ;;  %v677_v25 = vld [vmem:[%s3001_s1 + $0xa8] sm:$0xff]  ;;  %v474_v33 = vsel %vm143_vm0, %v125_v8, 0.0  ;;  %v62_v30 = vld [vmem:[%s3000_s0 + $0x178] sm:$0xff] }
  0xf0   :  { %v1235_v42 = vrot.slane %v598_v37, %v2346_v61  ;;  %331 = vadd.xlane.f32.xlu0 %v330_v34  ;;  %v497_v36 = vpop.xlane.xlu1 %496  ;;  %1699 = vmatprep.subr.mxu0 %v680_v44  ;;  %v126_v34 = vld [vmem:[%s3000_s0 + $0x378] sm:$0xff]  ;;  %v661_v31 = vld [vmem:[%s3001_s1 + $0x28] sm:$0xff]  ;;  %v698_v44 = vld [vmem:[%s3001_s1 + $0x150] sm:$0xff] }
  0xf1   :  { %v446_v50 = vpop.xlane.xlu0 %445  ;;  %v2534_v56 = vsel %vm908_vm7, %v1319_v41, %v2410_v45  ;;  %v645_v46 = vmul.f32 0.0625, %v497_v36  ;;  %v702_v45 = vld [vmem:[%s3001_s1 + $0x170] sm:$0xff]  ;;  %1700 = vmatpush3.msra.mxu0 %v664_v62 }
  0xf2   :  { %v2538_v58 = vsel %vm901_vm6, %v1235_v42, %v2414_v47  ;;  %v628_v60 = vmul.f32 0.0625, %v446_v50  ;;  %v679_v47 = vld [vmem:[%s3001_s1 + $0xb8] sm:$0xff]  ;;  %1723 = vmatpush3.msra.mxu1 %v702_v45  ;;  %v477_v50 = vsel %vm143_vm0, %v126_v34, 0.0 }
  0xf3   :  { %v1467_v5 = vrot.slane %v645_v46, %v2282_v2  ;;  %523 = vadd.xlane.f32.xlu1 %v522_v51  ;;  %1701 = vmatprep.subr.mxu0 %v679_v47  ;;  %v285_v51 = vsel %vm143_vm0, %v62_v30, 0.0  ;;  %v917_v47 = vadd.s32 4294967224, %v2079_v13 }
  0xf4   :  { %v1383_v6 = vrot.slane %v628_v60, %v2212_v3  ;;  %472 = vadd.xlane.f32.xlu0 %v471_v52  ;;  %v218_v59 = vpop.xlane.xlu1 %217  ;;  %v142_v3 = vld [vmem:[%s3000_s0 + $0x3f8] sm:$0xff]  ;;  %1724 = vmatprep.subr.mxu1 %v717_v0  ;;  %v674_v0 = vld [vmem:[%s3001_s1 + $0x90] sm:$0xff] }
  0xf5   :  { %v167_v7 = vpop.xlane.xlu0 %166  ;;  %v2573_v12 = vsel %vm894_vm5, %v1467_v5, %v2440_v63  ;;  %v552_v15 = vmul.f32 0.0625, %v218_v59  ;;  %v716_v63 = vld [vmem:[%s3001_s1 + $0x1e0] sm:$0xff]  ;;  %1702 = vmatpush3.msra.mxu0 %v663_v1  ;;  %1725 = vmatpush3.msra.mxu1 %v701_v4  ;;  %v525_v32 = vsel %vm143_vm0, %v142_v3, 0.0  ;;  %v675_v60 = vld [vmem:[%s3001_s1 + $0x98] sm:$0xff]  ;;  %v658_v4 = vld [vmem:[%s3001_s1 + $0x10] sm:$0xff]  ;;  %vm1519_vm0 = vcmask 1041409  }
  0xf6   :  { %v2577_v14 = vsel %vm887_vm4, %v1383_v6, %v2444_v10  ;;  %v535_v19 = vmul.f32 0.0625, %v167_v7  ;;  %v662_v10 = vld [vmem:[%s3001_s1 + $0x30] sm:$0xff]  ;;  %1703 = vmatprep.subr.mxu0 %v678_v20  ;;  %1726 = vmatprep.subr.mxu1 %v716_v63  ;;  %v712_v5 = vld [vmem:[%s3001_s1 + $0x1c0] sm:$0xff]  ;;  %v2698_v63 = vsub.s32 %v917_v47, %v2087_v16 }
  0xf7   :  { %v1008_v17 = vrot.slane %v552_v15, %v2558_v53  ;;  %334 = vadd.xlane.f32.xlu1 %v333_v9  ;;  %1704 = vmatpush3.msra.mxu0 %v662_v10  ;;  %v696_v59 = vld [vmem:[%s3001_s1 + $0x140] sm:$0xff]  ;;  %v673_v15 = vld [vmem:[%s3001_s1 + $0x88] sm:$0xff] }
  0xf8   :  { %v907_v24 = vrot.slane %v535_v19, %v2431_v57  ;;  %283 = vadd.xlane.f32.xlu0 %v282_v11  ;;  %v308_v28 = vpop.xlane.xlu1 %307  ;;  %1727 = vmatpush3.msra.mxu1 %v700_v21  ;;  %v711_v19 = vld [vmem:[%s3001_s1 + $0x1b8] sm:$0xff]  ;;  %v672_v10 = vld [vmem:[%s3001_s1 + $0x80] sm:$0xff]  ;;  %v710_v21 = vld [vmem:[%s3001_s1 + $0x1b0] sm:$0xff] }
  0xf9   :  { %v257_v29 = vpop.xlane.xlu0 %256  ;;  %v2609_v23 = vsel %vm915_vm8, %v1008_v17, %v2467_v27  ;;  %v582_v38 = vmul.f32 0.0625, %v308_v28  ;;  %v699_v27 = vld [vmem:[%s3001_s1 + $0x158] sm:$0xff]  ;;  %1705 = vmatprep.subr.mxu0 %v677_v25  ;;  %1728 = vmatprep.subr.mxu1 %v715_v26  ;;  %v694_v25 = vld [vmem:[%s3001_s1 + $0x130] sm:$0xff] }
  0xfa   :  { %v2613_v37 = vsel %vm908_vm7, %v907_v24, %v2471_v18  ;;  %v565_v39 = vmul.f32 0.0625, %v257_v29  ;;  %v676_v18 = vld [vmem:[%s3001_s1 + $0xa0] sm:$0xff]  ;;  %1706 = vmatpush3.msra.mxu0 %v661_v31  ;;  %1729 = vmatpush3.msra.mxu1 %v699_v27 }
  0xfb   :  { %v1156_v41 = vrot.slane %v582_v38, %v2346_v61  ;;  %526 = vadd.xlane.f32.xlu1 %v525_v32  ;;  %1707 = vmatprep.subr.mxu0 %v676_v18  ;;  %v708_v38 = vld [vmem:[%s3001_s1 + $0x1a0] sm:$0xff] }
  0xfc   :  { %v1072_v42 = vrot.slane %v565_v39, %v2282_v2  ;;  %475 = vadd.xlane.f32.xlu0 %v474_v33  ;;  %v410_v49 = vpop.xlane.xlu1 %409  ;;  %1730 = vmatprep.subr.mxu1 %v714_v40  ;;  %v709_v33 = vld [vmem:[%s3001_s1 + $0x1a8] sm:$0xff]  ;;  %v692_v31 = vld [vmem:[%s3001_s1 + $0x120] sm:$0xff] }
  0xfd   :  { %v359_v36 = vpop.xlane.xlu0 %358  ;;  %v2642_v52 = vsel %vm901_vm6, %v1156_v41, %v2494_v22  ;;  %v616_v55 = vmul.f32 0.0625, %v410_v49  ;;  %1708 = vmatpush3.msra.mxu0 %v660_v43  ;;  %v659_v22 = vld [vmem:[%s3001_s1 + $0x18] sm:$0xff]  ;;  %1731 = vmatpush3.msra.mxu1 %v698_v44 }
  0xfe   :  { %v2646_v54 = vsel %vm894_vm5, %v1072_v42, %v2498_v35  ;;  %v599_v46 = vmul.f32 0.0625, %v359_v36  ;;  %v697_v35 = vld [vmem:[%s3001_s1 + $0x148] sm:$0xff]  ;;  %1709 = vmatprep.subr.mxu0 %v675_v60  ;;  %1732 = vmatprep.subr.mxu1 %v713_v48  ;;  %v707_v42 = vld [vmem:[%s3001_s1 + $0x198] sm:$0xff] }
  0xff   :  { %v1324_v62 = vrot.slane %v616_v55, %v2558_v53  ;;  %478 = vadd.xlane.f32.xlu1 %v477_v50  ;;  %1710 = vmatpush3.msra.mxu0 %v659_v22  ;;  %v691_v43 = vld [vmem:[%s3001_s1 + $0x118] sm:$0xff]  ;;  %v690_v50 = vld [vmem:[%s3001_s1 + $0x110] sm:$0xff]  ;;  %v705_v48 = vld [vmem:[%s3001_s1 + $0x188] sm:$0xff] }
 0x100   :  { %v1240_v45 = vrot.slane %v599_v46, %v2431_v57  ;;  %286 = vadd.xlane.f32.xlu0 %v285_v51  ;;  %v500_v6 = vpop.xlane.xlu1 %499  ;;  %1733 = vmatpush3.msra.mxu1 %v697_v35  ;;  %v689_v22 = vld [vmem:[%s3001_s1 + $0x108] sm:$0xff] }
 0x101   :  { %v449_v1 = vpop.xlane.xlu0 %448  ;;  %v2677_v7 = vsel %vm915_vm8, %v1324_v62, %v2534_v56  ;;  %v646_v11 = vmul.f32 0.0625, %v500_v6  ;;  %1711 = vmatprep.subr.mxu0 %v674_v0  ;;  %v657_v56 = vld [vmem:[%s3001_s1 + $0x8] sm:$0xff]  ;;  %1734 = vmatprep.subr.mxu1 %v712_v5  ;;  %v688_v0 = vld [vmem:[%s3001_s1 + $0x100] sm:$0xff] }
 0x102   :  { %v2681_v9 = vsel %vm908_vm7, %v1240_v45, %v2538_v58  ;;  %v629_v3 = vmul.f32 0.0625, %v449_v1  ;;  %v695_v58 = vld [vmem:[%s3001_s1 + $0x138] sm:$0xff]  ;;  %1712 = vmatpush3.msra.mxu0 %v658_v4  ;;  %1735 = vmatpush3.msra.mxu1 %v696_v59 }
 0x103   :  { %v1472_v8 = vrot.slane %v646_v11, %v2346_v61  ;;  %1713 = vmatprep.subr.mxu0 %v673_v15  ;;  %1736 = vmatprep.subr.mxu1 %v711_v19 }
 0x104   :  { %v1388_v20 = vrot.slane %v629_v3, %v2282_v2  ;;  %v221_v17 = vpop.xlane.xlu1 %220  ;;  %v656_v2 = vld [vmem:[%s3001_s1] sm:$0xff]  ;;  %1714 = vmatpush3.msra.mxu0 %v657_v56  ;;  %1737 = vmatpush3.msra.mxu1 %v695_v58 }
 0x105   :  { %v170_v24 = vpop.xlane.xlu0 %169  ;;  %v2714_v26 = vsel %vm901_vm6, %v1472_v8, %v2573_v12  ;;  %v553_v29 = vmul.f32 0.0625, %v221_v17  ;;  %1715 = vmatprep.subr.mxu0 %v672_v10  ;;  %1738 = vmatprep.subr.mxu1 %v710_v21  ;;  %v693_v12 = vld [vmem:[%s3001_s1 + $0x128] sm:$0xff] }
 0x106   :  { %v2718_v28 = vsel %vm894_vm5, %v1388_v20, %v2577_v14  ;;  %v536_v32 = vmul.f32 0.0625, %v170_v24  ;;  %1716 = vmatpush3.msra.mxu0 %v656_v2  ;;  %1739 = vmatpush3.msra.mxu1 %v694_v25 }
 0x107   :  { %v1013_v34 = vrot.slane %v553_v29, %v2698_v63  ;;  %1740 = vmatprep.subr.mxu1 %v709_v33 }
 0x108   :  { %v914_v14 = vrot.slane %v536_v32, %v2558_v53  ;;  %v311_v39 = vpop.xlane.xlu1 %310  ;;  %1741 = vmatpush3.msra.mxu1 %v693_v12 }
 0x109   :  { %v260_v30 = vpop.xlane.xlu0 %259  ;;  %v1014_v27 = vsel %vm922_vm9, %v1013_v34, %v2609_v23  ;;  %v583_v40 = vmul.f32 0.0625, %v311_v39  ;;  %1742 = vmatprep.subr.mxu1 %v708_v38  ;;  %v706_v23 = vld [vmem:[%s3001_s1 + $0x190] sm:$0xff]  ;;  %v931_v39 = vadd.s32 4294967208, %v2079_v13 }
 0x10a   :  { %v916_v18 = vsel %vm915_vm8, %v914_v14, %v2613_v37  ;;  %v566_v41 = vmul.f32 0.0625, %v260_v30  ;;  %1743 = vmatpush3.msra.mxu1 %v692_v31 }
 0x10b   :  { %v1161_v44 = vrot.slane %v583_v40, %v2431_v57  ;;  %1744 = vmatprep.subr.mxu1 %v707_v42 }
 0x10c   :  { %v1077_v49 = vrot.slane %v566_v41, %v2346_v61  ;;  %v413_v37 = vpop.xlane.xlu1 %412  ;;  %1745 = vmatpush3.msra.mxu1 %v691_v43 }
 0x10d   :  { %v362_v36 = vpop.xlane.xlu0 %361  ;;  %v1162_v51 = vsel %vm908_vm7, %v1161_v44, %v2642_v52  ;;  %v617_v46 = vmul.f32 0.0625, %v413_v37  ;;  %1746 = vmatprep.subr.mxu1 %v706_v23  ;;  %v924_v52 = vadd.s32 4294967216, %v2079_v13  ;;  %v2802_v44 = vsub.s32 %v931_v39, %v2087_v16 }
 0x10e   :  { %v1078_v55 = vsel %vm901_vm6, %v1077_v49, %v2646_v54  ;;  %v600_v60 = vmul.f32 0.0625, %v362_v36  ;;  %1747 = vmatpush3.msra.mxu1 %v690_v50  ;;  %v704_v54 = vld [vmem:[%s3001_s1 + $0x180] sm:$0xff] }
 0x10f   :  { %v1329_v35 = vrot.slane %v617_v46, %v2698_v63  ;;  %1748 = vmatprep.subr.mxu1 %v705_v48  ;;  %v2778_v3 = vsub.s32 %v924_v52, %v2087_v16 }
 0x110   :  { %v1245_v62 = vrot.slane %v600_v60, %v2558_v53  ;;  %v503_v45 = vpop.xlane.xlu1 %502  ;;  %1749 = vmatpush3.msra.mxu1 %v689_v22 }
 0x111   :  { %v452_v47 = vpop.xlane.xlu0 %451  ;;  %v1330_v5 = vsel %vm922_vm9, %v1329_v35, %v2677_v7  ;;  %v647_v1 = vmul.f32 0.0625, %v503_v45  ;;  %1750 = vmatprep.subr.mxu1 %v704_v54 }
 0x112   :  { %v1246_v6 = vsel %vm915_vm8, %v1245_v62, %v2681_v9  ;;  %v630_v4 = vmul.f32 0.0625, %v452_v47  ;;  %1751 = vmatpush3.msra.mxu1 %v688_v0 }
 0x113   :  { %v1477_v59 = vrot.slane %v647_v1, %v2431_v57 }
 0x114   :  { %v1393_v11 = vrot.slane %v630_v4, %v2346_v61  ;;  %v224_v15 = vpop.xlane.xlu1 %223 }
 0x115   :  { %v173_v19 = vpop.xlane.xlu0 %172  ;;  %v1478_v7 = vsel %vm908_vm7, %v1477_v59, %v2714_v26  ;;  %v554_v56 = vmul.f32 0.0625, %v224_v15 }
 0x116   :  { %v1394_v9 = vsel %vm901_vm6, %v1393_v11, %v2718_v28  ;;  %v537_v58 = vmul.f32 0.0625, %v173_v19 }
 0x117   :  { %v1018_v8 = vrot.slane %v554_v56, %v2778_v3 }
 0x118   :  { %v921_v20 = vrot.slane %v537_v58, %v2698_v63  ;;  %v314_v61 = vpop.xlane.xlu1 %313 }
 0x119   :  { %v263_v10 = vpop.xlane.xlu0 %262  ;;  %v1019_v21 = vsel %vm929_vm10, %v1018_v8, %v1014_v27  ;;  %v584_v24 = vmul.f32 0.0625, %v314_v61 }
 0x11a   :  { %v923_v17 = vsel %vm922_vm9, %v921_v20, %v916_v18  ;;  %v567_v2 = vmul.f32 0.0625, %v263_v10 }
 0x11b   :  { %v1166_v25 = vrot.slane %v584_v24, %v2558_v53 }
 0x11c   :  { %v1082_v26 = vrot.slane %v567_v2, %v2431_v57  ;;  %v416_v28 = vpop.xlane.xlu1 %415 }
 0x11d   :  { %v365_v29 = vpop.xlane.xlu0 %364  ;;  %v1167_v32 = vsel %vm915_vm8, %v1166_v25, %v1162_v51  ;;  %v618_v12 = vmul.f32 0.0625, %v416_v28 }
 0x11e   :  { %v1083_v33 = vsel %vm908_vm7, %v1082_v26, %v1078_v55  ;;  %v601_v34 = vmul.f32 0.0625, %v365_v29 }
 0x11f   :  { %v1334_v14 = vrot.slane %v618_v12, %v2778_v3 }
 0x120   :  { %v1250_v38 = vrot.slane %v601_v34, %v2698_v63  ;;  %v506_v30 = vpop.xlane.xlu1 %505 }
 0x121   :  { %v455_v31 = vpop.xlane.xlu0 %454  ;;  %v2796_v27 = vsel %vm929_vm10, %v1334_v14, %v1330_v5  ;;  %v648_v40 = vmul.f32 0.0625, %v506_v30 }
 0x122   :  { %v1251_v18 = vsel %vm922_vm9, %v1250_v38, %v1246_v6  ;;  %v631_v41 = vmul.f32 0.0625, %v455_v31 }
 0x123   :  { %v1482_v42 = vrot.slane %v648_v40, %v2558_v53 }
 0x124   :  { %v1398_v43 = vrot.slane %v631_v41, %v2431_v57  ;;  %v227_v49 = vpop.xlane.xlu1 %226 }
 0x125   :  { %v176_v23 = vpop.xlane.xlu0 %175  ;;  %v1483_v37 = vsel %vm915_vm8, %v1482_v42, %v1478_v7  ;;  %v555_v50 = vmul.f32 0.0625, %v227_v49 }
 0x126   :  { %v1399_v36 = vsel %vm908_vm7, %v1398_v43, %v1394_v9  ;;  %v538_v51 = vmul.f32 0.0625, %v176_v23 }
 0x127   :  { %v1023_v55 = vrot.slane %v555_v50, %v2802_v44 }
 0x128   :  { %v928_v46 = vrot.slane %v538_v51, %v2778_v3  ;;  %v317_v60 = vpop.xlane.xlu1 %316 }
 0x129   :  { %v266_v48 = vpop.xlane.xlu0 %265  ;;  %v2809_v57 = vsel %vm936_vm11, %v1023_v55, %v1019_v21  ;;  %v585_v35 = vmul.f32 0.0625, %v317_v60  ;;  %v938_v60 = vadd.s32 4294967200, %v2079_v13 }
 0x12a   :  { %v930_v22 = vsel %vm929_vm10, %v928_v46, %v923_v17  ;;  %v568_v62 = vmul.f32 0.0625, %v266_v48  ;;  %v945_v48 = vadd.s32 4294967192, %v2079_v13 }
 0x12b   :  { %v1171_v52 = vrot.slane %v585_v35, %v2698_v63 }
 0x12c   :  { %v1087_v54 = vrot.slane %v568_v62, %v2558_v53  ;;  %v419_v45 = vpop.xlane.xlu1 %418 }
 0x12d   :  { %v368_v47 = vpop.xlane.xlu0 %367  ;;  %v1172_v0 = vsel %vm922_vm9, %v1171_v52, %v1167_v32  ;;  %v619_v52 = vmul.f32 0.0625, %v419_v45 }
 0x12e   :  { %v1088_v5 = vsel %vm915_vm8, %v1087_v54, %v1083_v33  ;;  %v602_v6 = vmul.f32 0.0625, %v368_v47  ;;  %v959_v54 = vadd.s32 4294967176, %v2079_v13  ;;  %v2869_v47 = vsub.s32 %v938_v60, %v2087_v16 }
 0x130   :  { %v1255_v1 = vrot.slane %v602_v6, %v2778_v3  ;;  %v509_v4 = vpop.xlane.xlu1 %508  ;;  %v2872_v6 = vsub.s32 %v945_v48, %v2087_v16 }
 0x131   :  { %v458_v59 = vpop.xlane.xlu0 %457  ;;  %v649_v15 = vmul.f32 0.0625, %v509_v4 }
 0x132   :  { %v2818_v11 = vsel %vm929_vm10, %v1255_v1, %v1251_v18  ;;  %v632_v19 = vmul.f32 0.0625, %v458_v59 }
 0x133   :  { %v1487_v7 = vrot.slane %v649_v15, %v2698_v63 }
 0x134   :  { %v1403_v9 = vrot.slane %v632_v19, %v2558_v53  ;;  %v230_v56 = vpop.xlane.xlu1 %229 }
 0x135   :  { %v179_v58 = vpop.xlane.xlu0 %178  ;;  %v2823_v8 = vsel %vm922_vm9, %v1487_v7, %v1483_v37 }
 0x136   :  { %v1404_v20 = vsel %vm915_vm8, %v1403_v9, %v1399_v36  ;;  %v539_v61 = vmul.f32 0.0625, %v179_v58  ;;  %v2883_v9 = vsub.s32 %v959_v54, %v2087_v16 }
 0x138   :  { %v935_v10 = vrot.slane %v539_v61, %v2802_v44  ;;  %v320_v21 = vpop.xlane.xlu1 %319 }
 0x139   :  { %v269_v17 = vpop.xlane.xlu0 %268  ;;  %v586_v2 = vmul.f32 0.0625, %v320_v21 }
 0x13a   :  { %v2828_v24 = vsel %vm936_vm11, %v935_v10, %v930_v22  ;;  %v569_v25 = vmul.f32 0.0625, %v269_v17  ;;  %v952_v22 = vadd.s32 4294967184, %v2079_v13  ;;  %v1339_v13 = vrot.slane %v619_v52, %v2802_v44 }
 0x13b   :  { %v1176_v26 = vrot.slane %v586_v2, %v2778_v3 }
 0x13c   :  { %v1092_v53 = vrot.slane %v569_v25, %v2698_v63  ;;  %v422_v28 = vpop.xlane.xlu1 %421  ;;  %v2875_v59 = vsub.s32 %v952_v22, %v2087_v16  ;;  %v1340_v16 = vsel %vm936_vm11, %v1339_v13, %v2796_v27 }
 0x13d   :  { %v2832_v29 = vpop.xlane.xlu0 %370  ;;  %v2835_v32 = vsel %vm929_vm10, %v1176_v26, %v1172_v0  ;;  %v556_v0 = vmul.f32 0.0625, %v230_v56 }
 0x13e   :  { %v2838_v33 = vsel %vm922_vm9, %v1092_v53, %v1088_v5  ;;  %v620_v5 = vmul.f32 0.0625, %v422_v28 }
 0x13f   :  { %v1028_v58 = vrot.slane %v556_v0, %v2869_v47 }
 0x140   :  { %v2840_v12 = vpop.xlane.xlu1 %511 }
 0x141   :  { %v461_v34 = vpop.xlane.xlu0 %460  ;;  %v1029_v28 = vsel %vm943_vm12, %v1028_v58, %v2809_v57 }
 0x142   :  { %v633_v14 = vmul.f32 0.0625, %v461_v34 }
 0x144   :  { %v1408_v38 = vrot.slane %v633_v14, %v2698_v63  ;;  %v233_v39 = vpop.xlane.xlu1 %232 }
 0x145   :  { %v2843_v30 = vpop.xlane.xlu0 %181  ;;  %v557_v1 = vmul.f32 0.0625, %v233_v39 }
 0x146   :  { %v2846_v31 = vsel %vm922_vm9, %v1408_v38, %v1404_v20  ;;  %v1344_v20 = vrot.slane %v620_v5, %v2869_v47  ;;  %v540_v22 = vmul.f32 0.0625, %v2843_v30 }
 0x147   :  { %v1033_v61 = vrot.slane %v557_v1, %v2872_v6 }
 0x148   :  { %v2848_v18 = vpop.xlane.xlu1 %322  ;;  %v1345_v34 = vsel %vm943_vm12, %v1344_v20, %v1340_v16 }
 0x149   :  { %v2850_v40 = vpop.xlane.xlu0 %271  ;;  %v1034_v38 = vsel %vm950_vm13, %v1033_v61, %v1029_v28  ;;  %v587_v58 = vmul.f32 0.0625, %v2848_v18 }
 0x14a   :  { %v570_v30 = vmul.f32 0.0625, %v2850_v40 }
 0x14c   :  { %v425_v41 = vpop.xlane.xlu1 %424 }
 0x14d   :  { %v374_v42 = vpop.xlane.xlu0 %373  ;;  %v621_v4 = vmul.f32 0.0625, %v425_v41  ;;  %v603_v41 = vmul.f32 0.0625, %v2832_v29 }
 0x14f   :  { %v1349_v10 = vrot.slane %v621_v4, %v2872_v6  ;;  %v1260_v29 = vrot.slane %v603_v41, %v2802_v44 }
 0x150   :  { %v2852_v43 = vpop.xlane.xlu1 %514 }
 0x151   :  { %v2854_v49 = vpop.xlane.xlu0 %463  ;;  %v1350_v39 = vsel %vm950_vm13, %v1349_v10, %v1345_v34  ;;  %v651_v20 = vmul.f32 0.0625, %v2852_v43  ;;  %v1097_v43 = vrot.slane %v570_v30, %v2778_v3 }
 0x152   :  { %v634_v40 = vmul.f32 0.0625, %v2854_v49 }
 0x153   :  { %v1497_v34 = vrot.slane %v651_v20, %v2802_v44 }
 0x154   :  { %v236_v23 = vpop.xlane.xlu1 %235 }
 0x155   :  { %v185_v37 = vpop.xlane.xlu0 %184  ;;  %v558_v15 = vmul.f32 0.0625, %v236_v23 }
 0x156   :  { %v541_v54 = vmul.f32 0.0625, %v185_v37 }
 0x157   :  { %v1038_v21 = vrot.slane %v558_v15, %v2875_v59 }
 0x158   :  { %v2856_v36 = vpop.xlane.xlu1 %325  ;;  %v949_v37 = vrot.slane %v541_v54, %v2872_v6 }
 0x159   :  { %v2858_v63 = vpop.xlane.xlu0 %274 }
 0x15c   :  { %v428_v50 = vpop.xlane.xlu1 %427 }
 0x15d   :  { %v377_v51 = vpop.xlane.xlu0 %376  ;;  %v622_v19 = vmul.f32 0.0625, %v428_v50  ;;  %v1039_v50 = vsel %vm957_vm14, %v1038_v21, %v1034_v38 }
 0x15e   :  { %v605_v0 = vmul.f32 0.0625, %v377_v51 }
 0x15f   :  { %v1354_v17 = vrot.slane %v622_v19, %v2875_v59  ;;  %v650_v19 = vmul.f32 0.0625, %v2840_v12 }
 0x160   :  { %v2860_v55 = vpop.xlane.xlu1 %517  ;;  %v1270_v51 = vrot.slane %v605_v0, %v2872_v6 }
 0x161   :  { %v2862_v46 = vpop.xlane.xlu0 %466  ;;  %v1355_v60 = vsel %vm957_vm14, %v1354_v17, %v1350_v39  ;;  %v1492_v18 = vrot.slane %v650_v19, %v2778_v3 }
 0x164   :  { %v239_v35 = vpop.xlane.xlu1 %238 }
 0x165   :  { %v188_v62 = vpop.xlane.xlu0 %187  ;;  %v559_v56 = vmul.f32 0.0625, %v239_v35  ;;  %v604_v35 = vmul.f32 0.0625, %v374_v42 }
 0x166   :  { %v542_v5 = vmul.f32 0.0625, %v188_v62  ;;  %v1261_v62 = vsel %vm936_vm11, %v1260_v29, %v2818_v11  ;;  %v1181_v11 = vrot.slane %v587_v58, %v2802_v44 }
 0x167   :  { %v1043_v26 = vrot.slane %v559_v56, %v2883_v9  ;;  %v942_v56 = vrot.slane %v540_v22, %v2869_v47  ;;  %v1265_v42 = vrot.slane %v604_v35, %v2869_v47  ;;  %v1493_v35 = vsel %vm929_vm10, %v1492_v18, %v2823_v8 }
 0x168   :  { %v2877_v7 = vpop.xlane.xlu1 %328  ;;  %v956_v12 = vrot.slane %v542_v5, %v2875_v59 }
 0x169   :  { %v2879_v45 = vpop.xlane.xlu0 %277  ;;  %v1044_v57 = vsel %vm964_vm15, %v1043_v26, %v1039_v50  ;;  %v1266_v16 = vsel %vm943_vm12, %v1265_v42, %v1261_v62  ;;  %v1413_v50 = vrot.slane %v634_v40, %v2778_v3  ;;  %v589_v22 = vmul.f32 0.0625, %v2877_v7 }
 0x16a   :  { %v1271_v28 = vsel %vm950_vm13, %v1270_v51, %v1266_v16 }
 0x16b   :  { %v1414_v8 = vsel %vm929_vm10, %v1413_v50, %v2846_v31  ;;  %v1191_v19 = vrot.slane %v589_v22, %v2872_v6 }
 0x16c   :  { %v431_v2 = vpop.xlane.xlu1 %430 }
 0x16d   :  { %v380_v25 = vpop.xlane.xlu0 %379  ;;  %v623_v53 = vmul.f32 0.0625, %v431_v2 }
 0x16e   :  { %v606_v1 = vmul.f32 0.0625, %v380_v25  ;;  %v944_v25 = vsel %vm943_vm12, %v942_v56, %v2828_v24 }
 0x16f   :  { %v1359_v14 = vrot.slane %v623_v53, %v2883_v9  ;;  %v951_v26 = vsel %vm950_vm13, %v949_v37, %v944_v25  ;;  %v588_v53 = vmul.f32 0.0625, %v2856_v36 }
 0x170   :  { %v521_v27 = vpop.xlane.xlu1 %520  ;;  %v1275_v61 = vrot.slane %v606_v1, %v2875_v59  ;;  %v958_v39 = vsel %vm957_vm14, %v956_v12, %v951_v26  ;;  %v1498_v1 = vsel %vm936_vm11, %v1497_v34, %v1493_v35 }
 0x171   :  { %v2901_v23 = vpop.xlane.xlu0 %469  ;;  %v1360_v48 = vsel %vm964_vm15, %v1359_v14, %v1355_v60  ;;  %v571_v14 = vmul.f32 0.0625, %v2858_v63  ;;  %v652_v60 = vmul.f32 0.0625, %v2860_v55  ;;  %v1186_v3 = vrot.slane %v588_v53, %v2869_v47 }
 0x172   :  { %v1521_v52 = vsel %vm1519_vm0, %v1360_v48, %v1044_v57  ;;  %v1276_v41 = vsel %vm957_vm14, %v1275_v61, %v1271_v28  ;;  %v635_v48 = vmul.f32 0.0625, %v2862_v46  ;;  %v653_v54 = vmul.f32 0.0625, %v521_v27 }
 0x173   :  { %1592 = vmatprep.mubr.f32.mxu0 %v1521_v52  ;;  %v1182_v52 = vsel %vm936_vm11, %v1181_v11, %v2835_v32  ;;  %v1098_v55 = vsel %vm929_vm10, %v1097_v43, %v2838_v33  ;;  %v1102_v0 = vrot.slane %v571_v14, %v2802_v44  ;;  %v1502_v32 = vrot.slane %v652_v60, %v2869_v47 }
 0x174   :  { %v281_v4 = vpop.xlane.xlu1 %280  ;;  %v1418_v27 = vrot.slane %v635_v48, %v2802_v44  ;;  %v572_v33 = vmul.f32 0.0625, %v2879_v45  ;;  %v1187_v56 = vsel %vm943_vm12, %v1186_v3, %v1182_v52  ;;  %v1507_v58 = vrot.slane %v653_v54, %v2872_v6  ;;  %v1684_v3 = vld [vmem:[%s3002_s2] ss:$0 sm:$0xff] }
 0x175   :  { %v191_v15 = vpop.xlane.xlu0 %190  ;;  %v573_v30 = vmul.f32 0.0625, %v281_v4  ;;  %v1103_v37 = vsel %vm936_vm11, %v1102_v0, %v1098_v55  ;;  %v1503_v12 = vsel %vm943_vm12, %v1502_v32, %v1498_v1  ;;  %v1192_v18 = vsel %vm950_vm13, %v1191_v19, %v1187_v56 }
 0x176   :  { %v543_v13 = vmul.f32 0.0625, %v191_v15  ;;  %v1107_v4 = vrot.slane %v572_v33, %v2869_v47  ;;  %v1508_v25 = vsel %vm950_vm13, %v1507_v58, %v1503_v12 }
 0x177   :  { %v1112_v40 = vrot.slane %v573_v30, %v2872_v6 }
 0x178   :  { %v383_v10 = vpop.xlane.xlu1 %382  ;;  %v963_v17 = vrot.slane %v543_v13, %v2883_v9  ;;  %v636_v13 = vmul.f32 0.0625, %v2901_v23  ;;  %v1108_v14 = vsel %vm943_vm12, %v1107_v4, %v1103_v37 }
 0x179   :  { %v332_v21 = vpop.xlane.xlu0 %331  ;;  %v607_v2 = vmul.f32 0.0625, %v383_v10  ;;  %v1419_v10 = vsel %vm936_vm11, %v1418_v27, %v1414_v8 }
 0x17a   :  { %v965_v36 = vsel %vm964_vm15, %v963_v17, %v958_v39  ;;  %v590_v46 = vmul.f32 0.0625, %v332_v21  ;;  %v1423_v21 = vrot.slane %v636_v13, %v2869_v47 }
 0x17b   :  { %v1280_v49 = vrot.slane %v607_v2, %v2883_v9 }
 0x17c   :  { %v524_v38 = vpop.xlane.xlu1 %523  ;;  %v1196_v31 = vrot.slane %v590_v46, %v2875_v59 }
 0x17d   :  { %v473_v24 = vpop.xlane.xlu0 %472  ;;  %v1281_v57 = vsel %vm964_vm15, %v1280_v49, %v1276_v41  ;;  %v654_v29 = vmul.f32 0.0625, %v524_v38  ;;  %v1424_v38 = vsel %vm943_vm12, %v1423_v21, %v1419_v10 }
 0x17e   :  { %v1520_v63 = vsel %vm1519_vm0, %v1281_v57, %v965_v36  ;;  %v637_v42 = vmul.f32 0.0625, %v473_v24  ;;  %v1197_v53 = vsel %vm957_vm14, %v1196_v31, %v1192_v18 }
 0x17f   :  { %1593 = vmatmul.mubr.f32.vlgmr.msra.gmra.mxu0 %v1520_v63  ;;  %v1512_v51 = vrot.slane %v654_v29, %v2875_v59 }
 0x180   :  { %v335_v7 = vpop.xlane.xlu1 %334  ;;  %v1428_v17 = vrot.slane %v637_v42, %v2872_v6 }
 0x181   :  { %v284_v5 = vpop.xlane.xlu0 %283  ;;  %v591_v15 = vmul.f32 0.0625, %v335_v7  ;;  %v1513_v47 = vsel %vm957_vm14, %v1512_v51, %v1508_v25 }
 0x182   :  { %v574_v62 = vmul.f32 0.0625, %v284_v5  ;;  %v1429_v39 = vsel %vm950_vm13, %v1428_v17, %v1424_v38 }
 0x183   :  { %v1201_v45 = vrot.slane %v591_v15, %v2883_v9 }
 0x184   :  { %v527_v44 = vpop.xlane.xlu1 %526  ;;  %v1117_v11 = vrot.slane %v574_v62, %v2875_v59 }
 0x185   :  { %v476_v20 = vpop.xlane.xlu0 %475  ;;  %v655_v23 = vmul.f32 0.0625, %v527_v44  ;;  %v1202_v34 = vsel %vm964_vm15, %v1201_v45, %v1197_v53 }
 0x186   :  { %v638_v61 = vmul.f32 0.0625, %v476_v20 }
 0x187   :  { %v1517_v2 = vrot.slane %v655_v23, %v2883_v9 }
 0x188   :  { %v1433_v43 = vrot.slane %v638_v61, %v2875_v59  ;;  %v479_v16 = vpop.xlane.xlu1 %478  ;;  %v1113_v59 = vsel %vm950_vm13, %v1112_v40, %v1108_v14 }
 0x189   :  { %v287_v26 = vpop.xlane.xlu0 %286  ;;  %v639_v28 = vmul.f32 0.0625, %v479_v16  ;;  %v1518_v6 = vsel %vm964_vm15, %v1517_v2, %v1513_v47  ;;  %v1118_v60 = vsel %vm957_vm14, %v1117_v11, %v1113_v59 }
 0x18a   :  { %v575_v49 = vmul.f32 0.0625, %v287_v26  ;;  %v1523_v24 = vsel %vm1519_vm0, %v1518_v6, %v1202_v34  ;;  %v1434_v36 = vsel %vm957_vm14, %v1433_v43, %v1429_v39 }
 0x18b   :  { %v1438_v41 = vrot.slane %v639_v28, %v2883_v9  ;;  %1662 = vmatprep.mubr.f32.mxu1 %v1523_v24 }
 0x18c   :  { %v1122_v50 = vrot.slane %v575_v49, %v2883_v9 }
 0x18d   :  { %v1439_v48 = vsel %vm964_vm15, %v1438_v41, %v1434_v36 }
 0x18e   :  { %v1123_v57 = vsel %vm964_vm15, %v1122_v50, %v1118_v60 }
 0x18f   :  { %v1522_v22 = vsel %vm1519_vm0, %v1439_v48, %v1123_v57 }
 0x190   :  { %1663 = vmatmul.mubr.f32.vlgmr.msra.gmra.mxu1 %v1522_v22 }
 0x23f   :  { %v1717_v63 = vpop.f32.mrf.mxu0 }
 0x241   :  { %v1718_v35 = vpop.f32.mrf.mxu0 }
 0x242   :  { %v1719_v52 = vadd.f32 %v1718_v35, %v1717_v63 }
 0x244   :  { %v1595_v55 = vadd.f32 %v1719_v52, %v1684_v3 }
 0x250   :  { %v1752_v9 = vpop.f32.mrf.mxu1 }
 0x252   :  { %v1753_v54 = vpop.f32.mrf.mxu1 }
 0x253   :  { %v1754_v0 = vadd.f32 %v1753_v54, %v1752_v9 }
 0x255   :  { %v1665_v46 = vadd.f32 %v1754_v0, %v1595_v55 }
 0x257   :  { %1669 = vst.msk [vmem:[#allocation2] sm:$0x3] %vm1668_vm1, %v1665_v46 }
 0x258   :  { %1767 = shalt.err (!%p1764_p4)
}
 0x259   :  { %1679 = dma.vmem_to_hbm [thread:$0]  %s1677_s17, 32, %s3003_s3, [#allocation3]  }
 0x25a   :  { %1776 = dma.done.wait [#allocation3], 32  }
 0x25b   :  { %1777 = vsyncadd [#allocation3], 4294967264 }
 0x25c   :  { %1683 = vsyncpa [#allocation3], 1 }

</bundles_post_ra>
